<compile_context>
chip_gen: v7x
topology: tpu7x:2x2x1
jax: 0.10.0
libtpu: 0.0.40
codegen_flags: <defaults>
</compile_context>

<pallas_src>
import functools

import jax
import jax.numpy as jnp
from jax.experimental import pallas as pl
from jax.experimental.pallas import tpu as pltpu


# ----------------------------- Pallas kernels -----------------------------

def _gemm_bias_kernel(a_ref, b_ref, bias_ref, o_ref, *, relu, softmax):
    acc = jnp.dot(a_ref[...], b_ref[...], preferred_element_type=jnp.float32)
    acc = acc + bias_ref[...]
    if relu:
        acc = jnp.maximum(acc, 0.0)
    if softmax:
        m = jnp.max(acc, axis=-1, keepdims=True)
        e = jnp.exp(acc - m)
        acc = e / jnp.sum(e, axis=-1, keepdims=True)
    o_ref[...] = acc.astype(o_ref.dtype)


def _round_up(v, m):
    return ((v + m - 1) // m) * m


def gemm_bias(a, b, bias, *, relu=False, softmax=False):
    """out = epilogue( a @ b + bias ); a:(M,K) b:(K,N) bias:(N,). BN is pre-folded into b."""
    M, K = a.shape
    K2, Nf = b.shape
    assert K == K2
    m8 = _round_up(M, 8)
    if m8 > 256:
        tm = 256                              # big GEMMs: 256-row tiles (grid >= 2)
    elif m8 >= 128:
        tm = _round_up(m8 // 2, 8)            # medium GEMMs: split so both v7x TCs get work
    else:
        tm = m8                               # tiny GEMMs: one tile (per-step overhead dominates)
    Mp = _round_up(m8, tm)
    if Mp != M:
        a = jnp.pad(a, ((0, Mp - M), (0, 0)))
    out = pl.pallas_call(
        functools.partial(_gemm_bias_kernel, relu=relu, softmax=softmax),
        out_shape=jax.ShapeDtypeStruct((Mp, Nf), jnp.float32),
        grid=(Mp // tm,),
        in_specs=[
            pl.BlockSpec((tm, K), lambda i: (i, 0)),
            pl.BlockSpec((K, Nf), lambda i: (0, 0)),
            pl.BlockSpec((1, Nf), lambda i: (0, 0)),
        ],
        out_specs=pl.BlockSpec((tm, Nf), lambda i: (i, 0)),
        compiler_params=pltpu.CompilerParams(dimension_semantics=("parallel",)),
    )(a, b, bias.reshape(1, Nf))
    return out[:M]


def _kmax_kernel(x_ref, o_ref, *, relu):
    m = jnp.max(x_ref[...], axis=0)
    if relu:
        m = jnp.maximum(m, 0.0)
    o_ref[...] = m


def kmax(x, *, relu):
    """Elementwise max over leading axis of (K, B, L), optional fused ReLU. L is lane-dense."""
    K, B, L = x.shape
    return pl.pallas_call(
        functools.partial(_kmax_kernel, relu=relu),
        out_shape=jax.ShapeDtypeStruct((B, L), x.dtype),
        grid=(1,),
        in_specs=[pl.BlockSpec((K, B, L), lambda i: (0, 0, 0))],
        out_specs=pl.BlockSpec((B, L), lambda i: (0, 0)),
    )(x)


def _spp_kernel(x_ref, o_ref):
    # Rows 0..3: adaptive-max-pool(2,2) cells (row-major); row 4: (1,1) pool (== global max,
    # exact because the 2x2 cells partition the input).
    x = x_ref[...]                      # (N, H, W, C)
    _, H, W, _ = x_ref.shape
    cells = []
    for oi in range(2):
        h0 = (oi * H) // 2
        h1 = -((-(oi + 1) * H) // 2)    # ceil
        for oj in range(2):
            w0 = (oj * W) // 2
            w1 = -((-(oj + 1) * W) // 2)
            cells.append(jnp.max(x[:, h0:h1, w0:w1, :], axis=(1, 2)))  # (N, C)
    cells.append(jnp.max(x, axis=(1, 2)))                              # (1,1) pool
    o_ref[...] = jnp.stack(cells, axis=1)  # (N, 5, C)


def spp_2x2_and_1x1(x):
    # TODO(synk): Spatial_Pooling source was not provided; implemented as adaptive MAX
    # pooling (classic SPP / nn.AdaptiveMaxPool2d semantics).
    N, H, W, C = x.shape
    return pl.pallas_call(
        _spp_kernel,
        out_shape=jax.ShapeDtypeStruct((N, 5, C), x.dtype),
        grid=(1,),
        in_specs=[pl.BlockSpec((N, H, W, C), lambda i: (0, 0, 0, 0))],
        out_specs=pl.BlockSpec((N, 5, C), lambda i: (0, 0, 0)),
    )(x)


# ----------------------------- JAX glue (layout / im2col / pooling views) -----------------------------

def im2col(x, kh, kw, stride, padding):
    """NHWC -> (N*OH*OW, kh*kw*C) patches; K ordering is (kh, kw, cin)."""
    N, H, W, C = x.shape
    if padding:
        x = jnp.pad(x, ((0, 0), (padding, padding), (padding, padding), (0, 0)))
    Hp, Wp = H + 2 * padding, W + 2 * padding
    OH = (Hp - kh) // stride + 1
    OW = (Wp - kw) // stride + 1
    cols = []
    for i in range(kh):
        for j in range(kw):
            cols.append(x[:, i:i + stride * (OH - 1) + 1:stride,
                            j:j + stride * (OW - 1) + 1:stride, :])
    patches = jnp.concatenate(cols, axis=-1)
    return patches.reshape(N * OH * OW, kh * kw * C), (N, OH, OW)


def maxpool_3x3_s1_p1(x):
    """MaxPool2d(kernel=3, stride=1, padding=1, ceil_mode=True) -> same spatial size."""
    N, H, W, C = x.shape
    xp = jnp.pad(x, ((0, 0), (1, 1), (1, 1), (0, 0)), constant_values=-jnp.inf)
    views = [xp[:, i:i + H, j:j + W, :] for i in range(3) for j in range(3)]
    stacked = jnp.stack(views, 0).reshape(9, N, H * W * C)   # lane-dense last dim
    return kmax(stacked, relu=False).reshape(N, H, W, C)


def maxpool_2x2_s2(x, *, relu):
    """MaxPool2d(kernel=2, stride=2) (+ fused ReLU); 4 shifted views -> lane-dense kmax."""
    N, H, W, C = x.shape
    OH, OW = (H - 2) // 2 + 1, (W - 2) // 2 + 1
    views = [x[:, di:di + 2 * (OH - 1) + 1:2, dj:dj + 2 * (OW - 1) + 1:2, :]
             for di in range(2) for dj in range(2)]
    stacked = jnp.stack(views, 0).reshape(4, N, OH * OW * C)  # lane-dense last dim
    return kmax(stacked, relu=relu).reshape(N, OH, OW, C)


# ----------------------------- Parameters (deterministic) -----------------------------

def init_params(key):
    ks = iter(jax.random.split(key, 64))

    def conv_w(cout, cin, k):
        return 0.1 * jax.random.normal(next(ks), (cout, cin, k, k), jnp.float32)

    def bn_p(c):
        return (1.0 + 0.05 * jax.random.normal(next(ks), (c,), jnp.float32),   # gamma
                0.05 * jax.random.normal(next(ks), (c,), jnp.float32),         # beta
                0.05 * jax.random.normal(next(ks), (c,), jnp.float32),         # running_mean
                1.0 + 0.1 * jnp.abs(jax.random.normal(next(ks), (c,), jnp.float32)))  # running_var

    p = {}
    # Inception(3, ch1x1=10, ch3x3red=10, ch3x3=20, ch5x5red=10, ch5x5=20, pool_proj=10)
    p['b1_w'] = conv_w(10, 3, 1);   p['b1_bn'] = bn_p(10)
    p['b2a_w'] = conv_w(10, 3, 1);  p['b2a_bn'] = bn_p(10)
    p['b2b_w'] = conv_w(20, 10, 3); p['b2b_bn'] = bn_p(20)
    p['b3a_w'] = conv_w(10, 3, 1);  p['b3a_bn'] = bn_p(10)
    p['b3b_w'] = conv_w(20, 10, 3); p['b3b_bn'] = bn_p(20)
    p['b4_w'] = conv_w(10, 3, 1);   p['b4_bn'] = bn_p(10)
    # conv1 / conv2 (bias, no BN)
    p['conv1_w'] = conv_w(80, 60, 2)
    p['conv1_b'] = 0.05 * jax.random.normal(next(ks), (80,), jnp.float32)
    p['conv2_w'] = conv_w(100, 80, 2)
    p['conv2_b'] = 0.05 * jax.random.normal(next(ks), (100,), jnp.float32)
    # fc1: 100*2*2 + 100*1*1 = 500 -> 150 ; fc2: 150 -> 10
    p['fc1_w'] = 0.05 * jax.random.normal(next(ks), (150, 500), jnp.float32)
    p['fc1_b'] = 0.05 * jax.random.normal(next(ks), (150,), jnp.float32)
    p['fc2_w'] = 0.05 * jax.random.normal(next(ks), (10, 150), jnp.float32)
    p['fc2_b'] = 0.05 * jax.random.normal(next(ks), (10,), jnp.float32)
    return p


def prepare_params(p):
    """Build GEMM-ready operands ONCE (BN folded into weights, weights pre-reshaped)."""
    def bn_fold(bn):
        gamma, beta, mean, var = bn
        scale = gamma / jnp.sqrt(var + 1e-3)      # BatchNorm2d(eps=0.001), eval mode
        return scale, beta - mean * scale

    def conv_wmat(w):                             # OIHW -> (KH*KW*Cin, Cout), im2col order
        cout, cin, kh, kw = w.shape
        return jnp.transpose(w, (2, 3, 1, 0)).reshape(kh * kw * cin, cout)

    q = {}
    # Fused 1x1 branches over [x | maxpool3x3(x)] (6 in-ch) -> [b1 | b2a | b3a | b4] (40 out-ch)
    w1 = conv_wmat(p['b1_w']);  s1, c1 = bn_fold(p['b1_bn'])
    w2 = conv_wmat(p['b2a_w']); s2, c2 = bn_fold(p['b2a_bn'])
    w3 = conv_wmat(p['b3a_w']); s3, c3 = bn_fold(p['b3a_bn'])
    w4 = conv_wmat(p['b4_w']);  s4, c4 = bn_fold(p['b4_bn'])
    top = jnp.concatenate([w1 * s1, w2 * s2, w3 * s3, jnp.zeros((3, 10), jnp.float32)], axis=1)
    bot = jnp.concatenate([jnp.zeros((3, 30), jnp.float32), w4 * s4], axis=1)
    q['inc1_w'] = jnp.concatenate([top, bot], axis=0)           # (6, 40)
    q['inc1_b'] = jnp.concatenate([c1, c2, c3, c4])             # (40,)

    # Fused block-diagonal 3x3 conv: [b2a | b3a] (20 ch) -> [b2b | b3b] (40 ch)
    w_comb = jnp.zeros((40, 20, 3, 3), jnp.float32)
    w_comb = w_comb.at[:20, :10].set(p['b2b_w'])
    w_comb = w_comb.at[20:, 10:].set(p['b3b_w'])
    sb, cb = bn_fold(p['b2b_bn'])
    sc, cc = bn_fold(p['b3b_bn'])
    q['inc3_w'] = conv_wmat(w_comb) * jnp.concatenate([sb, sc])[None, :]   # (180, 40)
    q['inc3_b'] = jnp.concatenate([cb, cc])                                # (40,)

    # conv1 / conv2 (bias convs)
    q['conv1_w'] = conv_wmat(p['conv1_w']); q['conv1_b'] = p['conv1_b']
    q['conv2_w'] = conv_wmat(p['conv2_w']); q['conv2_b'] = p['conv2_b']
    # fc layers (PyTorch Linear: y = x @ W.T + b)
    q['fc1_w'] = p['fc1_w'].T; q['fc1_b'] = p['fc1_b']
    q['fc2_w'] = p['fc2_w'].T; q['fc2_b'] = p['fc2_b']
    return q


# ----------------------------- Forward pass -----------------------------

def model_forward(qp, x_nchw):
    # x_nchw: (N, 3, H, W) float32  (PyTorch input convention)
    x = jnp.transpose(x_nchw, (0, 2, 3, 1))          # -> NHWC (N, 16, 16, 3)
    N, H, W, C = x.shape

    # --- InceptionA ---
    xpool = maxpool_3x3_s1_p1(x)                     # branch4 pre-pool
    x6 = jnp.concatenate([x, xpool], axis=-1)        # (N, H, W, 6)
    out1 = gemm_bias(x6.reshape(N * H * W, 6), qp['inc1_w'], qp['inc1_b'], relu=True)
    out1 = out1.reshape(N, H, W, 40)                 # [b1 | b2a | b3a | b4]

    patches, (_, OH, OW) = im2col(out1[..., 10:30], 3, 3, 1, 1)      # [b2a | b3a]
    mid = gemm_bias(patches, qp['inc3_w'], qp['inc3_b'], relu=True).reshape(N, OH, OW, 40)

    inc = jnp.concatenate([out1[..., :10], mid[..., :20], mid[..., 20:], out1[..., 30:]],
                          axis=-1)                   # == torch.cat(dim=1) in NCHW, C=60

    # --- conv1 -> maxpool(2,2) -> relu ---
    patches, (_, OH, OW) = im2col(inc, 2, 2, 2, 1)
    c1 = gemm_bias(patches, qp['conv1_w'], qp['conv1_b']).reshape(N, OH, OW, 80)
    c1 = maxpool_2x2_s2(c1, relu=True)               # (N, 4, 4, 80)

    # --- conv2 -> maxpool(2,2) -> relu ---
    patches, (_, OH, OW) = im2col(c1, 2, 2, 2, 1)
    c2 = gemm_bias(patches, qp['conv2_w'], qp['conv2_b']).reshape(N, OH, OW, 100)
    c2 = maxpool_2x2_s2(c2, relu=True)               # (N, 1, 1, 100)

    # --- SPP (2,2) + (1,1) in one kernel, flattened in PyTorch NCHW .view() order ---
    s = spp_2x2_and_1x1(c2)                          # (N, 5, 100)
    Cc = c2.shape[-1]
    f1 = jnp.transpose(s[:, :4, :], (0, 2, 1)).reshape(N, 4 * Cc)   # (N, 400)
    f2 = s[:, 4, :]                                                 # (N, 100)
    feat = jnp.concatenate([f1, f2], axis=1)                        # (N, 500)

    # dropout(p=0.2) is identity at inference
    h = gemm_bias(feat, qp['fc1_w'], qp['fc1_b'], relu=True)
    return gemm_bias(h, qp['fc2_w'], qp['fc2_b'], softmax=True)     # F.softmax(x, dim=1)


if __name__ == "__main__":
    key = jax.random.PRNGKey(0)
    pkey, xkey = jax.random.split(key)
    params = init_params(pkey)
    prepped = prepare_params(params)                 # weight reshapes / BN folding done once
    x = jax.random.normal(xkey, (2, 3, 16, 16), jnp.float32)  # NCHW like the PyTorch module

    out = jax.jit(model_forward)(prepped, x)
    out = jax.block_until_ready(out)

    assert out.shape == (2, 10), out.shape
    assert bool(jnp.all(jnp.abs(jnp.sum(out, axis=1) - 1.0) < 1e-4))
    print("KERNEL_OK")
</pallas_src>

<mosaic_0001>
module attributes {stable_mosaic.version = 11 : i64} {
  func.func @_kmax_kernel(%arg0: i32, %arg1: memref<9x2x768xf32, #tpu.memory_space<vmem>>, %arg2: memref<2x768xf32, #tpu.memory_space<vmem>>) attributes {dimension_semantics = [#tpu.dimension_semantics<arbitrary>], iteration_bounds = array<i64: 1>, scalar_prefetch = 0 : i64, scratch_operands = 0 : i64, tpu.core_type = #tpu.core_type<tc>, window_params = [{pipeline_mode = #tpu.pipeline_mode<synchronous>, transform_indices = @transform_0, window_bounds = array<i64: 9, 2, 768>}, {pipeline_mode = #tpu.pipeline_mode<synchronous>, transform_indices = @transform_1, window_bounds = array<i64: 2, 768>}]} {
    %c0 = arith.constant 0 : index
    %c0_0 = arith.constant 0 : index
    %c0_1 = arith.constant 0 : index
    %0 = vector.load %arg1[%c0, %c0_0, %c0_1] : memref<9x2x768xf32, #tpu.memory_space<vmem>>, vector<9x2x768xf32>
    %cst = arith.constant dense<0xFF800000> : vector<2x768xf32>
    %1 = vector.multi_reduction <maximumf>, %0, %cst [0] : vector<9x2x768xf32> to vector<2x768xf32>
    %c0_2 = arith.constant 0 : index
    %c0_3 = arith.constant 0 : index
    %2 = vector.load %arg2[%c0_2, %c0_3] : memref<2x768xf32, #tpu.memory_space<vmem>>, vector<2x768xf32>
    tpu.vector_store %arg2[%c0_2, %c0_3], %1 {strides = array<i32>} : memref<2x768xf32, #tpu.memory_space<vmem>>, vector<2x768xf32>,
    return
  }
  func.func @transform_0(%arg0: i32) -> (i32, i32, i32) {
    %c0_i32 = arith.constant 0 : i32
    %c0_i32_0 = arith.constant 0 : i32
    %c0_i32_1 = arith.constant 0 : i32
    %c0_i32_2 = arith.constant 0 : i32
    return %c0_i32, %c0_i32_0, %c0_i32_1 : i32, i32, i32
  }
  func.func @transform_1(%arg0: i32) -> (i32, i32) {
    %c0_i32 = arith.constant 0 : i32
    %c0_i32_0 = arith.constant 0 : i32
    %c0_i32_1 = arith.constant 0 : i32
    return %c0_i32, %c0_i32_0 : i32, i32
  }
}

module attributes {stable_mosaic.version = 11 : i64} {
  func.func @_gemm_bias_kernel(%arg0: i32, %arg1: memref<256x6xf32, #tpu.memory_space<vmem>>, %arg2: memref<6x40xf32, #tpu.memory_space<vmem>>, %arg3: memref<1x40xf32, #tpu.memory_space<vmem>>, %arg4: memref<256x40xf32, #tpu.memory_space<vmem>>) attributes {dimension_semantics = [#tpu.dimension_semantics<parallel>], iteration_bounds = array<i64: 2>, scalar_prefetch = 0 : i64, scratch_operands = 0 : i64, tpu.core_type = #tpu.core_type<tc>, window_params = [{transform_indices = @transform_0, window_bounds = array<i64: 256, 6>}, {pipeline_mode = #tpu.pipeline_mode<synchronous>, transform_indices = @transform_1, window_bounds = array<i64: 6, 40>}, {pipeline_mode = #tpu.pipeline_mode<synchronous>, transform_indices = @transform_2, window_bounds = array<i64: 1, 40>}, {transform_indices = @transform_3, window_bounds = array<i64: 256, 40>}]} {
    %c0 = arith.constant 0 : index
    %c0_0 = arith.constant 0 : index
    %0 = vector.load %arg1[%c0, %c0_0] : memref<256x6xf32, #tpu.memory_space<vmem>>, vector<256x6xf32>
    %c0_1 = arith.constant 0 : index
    %c0_2 = arith.constant 0 : index
    %1 = vector.load %arg2[%c0_1, %c0_2] : memref<6x40xf32, #tpu.memory_space<vmem>>, vector<6x40xf32>
    %cst = arith.constant dense<0.000000e+00> : vector<256x40xf32>
    %2 = tpu.matmul %0, %1, %cst {dimension_numbers = #tpu.dot_dimension_numbers<[1], [0], [0], [1], [0, 0, 1, 1], [], []>} : vector<256x6xf32>, vector<6x40xf32>, vector<256x40xf32> -> vector<256x40xf32>
    %c0_3 = arith.constant 0 : index
    %c0_4 = arith.constant 0 : index
    %3 = vector.load %arg3[%c0_3, %c0_4] : memref<1x40xf32, #tpu.memory_space<vmem>>, vector<1x40xf32>
    %4 = vector.broadcast %3 : vector<1x40xf32> to vector<256x40xf32>
    %5 = arith.addf %2, %4 : vector<256x40xf32>
    %cst_5 = arith.constant 0.000000e+00 : f32
    %6 = vector.broadcast %cst_5 : f32 to vector<256x40xf32>
    %7 = arith.maximumf %5, %6 : vector<256x40xf32>
    %c0_6 = arith.constant 0 : index
    %c0_7 = arith.constant 0 : index
    %8 = vector.load %arg4[%c0_6, %c0_7] : memref<256x40xf32, #tpu.memory_space<vmem>>, vector<256x40xf32>
    tpu.vector_store %arg4[%c0_6, %c0_7], %7 {strides = array<i32>} : memref<256x40xf32, #tpu.memory_space<vmem>>, vector<256x40xf32>,
    return
  }
  func.func @transform_0(%arg0: i32) -> (i32, i32) {
    %c0_i32 = arith.constant 0 : i32
    %c0_i32_0 = arith.constant 0 : i32
    return %arg0, %c0_i32 : i32, i32
  }
  func.func @transform_1(%arg0: i32) -> (i32, i32) {
    %c0_i32 = arith.constant 0 : i32
    %c0_i32_0 = arith.constant 0 : i32
    %c0_i32_1 = arith.constant 0 : i32
    return %c0_i32, %c0_i32_0 : i32, i32
  }
  func.func @transform_2(%arg0: i32) -> (i32, i32) {
    %c0_i32 = arith.constant 0 : i32
    %c0_i32_0 = arith.constant 0 : i32
    %c0_i32_1 = arith.constant 0 : i32
    return %c0_i32, %c0_i32_0 : i32, i32
  }
  func.func @transform_3(%arg0: i32) -> (i32, i32) {
    %c0_i32 = arith.constant 0 : i32
    %c0_i32_0 = arith.constant 0 : i32
    return %arg0, %c0_i32 : i32, i32
  }
}

module attributes {stable_mosaic.version = 11 : i64} {
  func.func @_gemm_bias_kernel(%arg0: i32, %arg1: memref<256x180xf32, #tpu.memory_space<vmem>>, %arg2: memref<180x40xf32, #tpu.memory_space<vmem>>, %arg3: memref<1x40xf32, #tpu.memory_space<vmem>>, %arg4: memref<256x40xf32, #tpu.memory_space<vmem>>) attributes {dimension_semantics = [#tpu.dimension_semantics<parallel>], iteration_bounds = array<i64: 2>, scalar_prefetch = 0 : i64, scratch_operands = 0 : i64, tpu.core_type = #tpu.core_type<tc>, window_params = [{transform_indices = @transform_0, window_bounds = array<i64: 256, 180>}, {pipeline_mode = #tpu.pipeline_mode<synchronous>, transform_indices = @transform_1, window_bounds = array<i64: 180, 40>}, {pipeline_mode = #tpu.pipeline_mode<synchronous>, transform_indices = @transform_2, window_bounds = array<i64: 1, 40>}, {transform_indices = @transform_3, window_bounds = array<i64: 256, 40>}]} {
    %c0 = arith.constant 0 : index
    %c0_0 = arith.constant 0 : index
    %0 = vector.load %arg1[%c0, %c0_0] : memref<256x180xf32, #tpu.memory_space<vmem>>, vector<256x180xf32>
    %c0_1 = arith.constant 0 : index
    %c0_2 = arith.constant 0 : index
    %1 = vector.load %arg2[%c0_1, %c0_2] : memref<180x40xf32, #tpu.memory_space<vmem>>, vector<180x40xf32>
    %cst = arith.constant dense<0.000000e+00> : vector<256x40xf32>
    %2 = tpu.matmul %0, %1, %cst {dimension_numbers = #tpu.dot_dimension_numbers<[1], [0], [0], [1], [0, 0, 1, 1], [], []>} : vector<256x180xf32>, vector<180x40xf32>, vector<256x40xf32> -> vector<256x40xf32>
    %c0_3 = arith.constant 0 : index
    %c0_4 = arith.constant 0 : index
    %3 = vector.load %arg3[%c0_3, %c0_4] : memref<1x40xf32, #tpu.memory_space<vmem>>, vector<1x40xf32>
    %4 = vector.broadcast %3 : vector<1x40xf32> to vector<256x40xf32>
    %5 = arith.addf %2, %4 : vector<256x40xf32>
    %cst_5 = arith.constant 0.000000e+00 : f32
    %6 = vector.broadcast %cst_5 : f32 to vector<256x40xf32>
    %7 = arith.maximumf %5, %6 : vector<256x40xf32>
    %c0_6 = arith.constant 0 : index
    %c0_7 = arith.constant 0 : index
    %8 = vector.load %arg4[%c0_6, %c0_7] : memref<256x40xf32, #tpu.memory_space<vmem>>, vector<256x40xf32>
    tpu.vector_store %arg4[%c0_6, %c0_7], %7 {strides = array<i32>} : memref<256x40xf32, #tpu.memory_space<vmem>>, vector<256x40xf32>,
    return
  }
  func.func @transform_0(%arg0: i32) -> (i32, i32) {
    %c0_i32 = arith.constant 0 : i32
    %c0_i32_0 = arith.constant 0 : i32
    return %arg0, %c0_i32 : i32, i32
  }
  func.func @transform_1(%arg0: i32) -> (i32, i32) {
    %c0_i32 = arith.constant 0 : i32
    %c0_i32_0 = arith.constant 0 : i32
    %c0_i32_1 = arith.constant 0 : i32
    return %c0_i32, %c0_i32_0 : i32, i32
  }
  func.func @transform_2(%arg0: i32) -> (i32, i32) {
    %c0_i32 = arith.constant 0 : i32
    %c0_i32_0 = arith.constant 0 : i32
    %c0_i32_1 = arith.constant 0 : i32
    return %c0_i32, %c0_i32_0 : i32, i32
  }
  func.func @transform_3(%arg0: i32) -> (i32, i32) {
    %c0_i32 = arith.constant 0 : i32
    %c0_i32_0 = arith.constant 0 : i32
    return %arg0, %c0_i32 : i32, i32
  }
}

module attributes {stable_mosaic.version = 11 : i64} {
  func.func @_gemm_bias_kernel(%arg0: i32, %arg1: memref<88x240xf32, #tpu.memory_space<vmem>>, %arg2: memref<240x80xf32, #tpu.memory_space<vmem>>, %arg3: memref<1x80xf32, #tpu.memory_space<vmem>>, %arg4: memref<88x80xf32, #tpu.memory_space<vmem>>) attributes {dimension_semantics = [#tpu.dimension_semantics<parallel>], iteration_bounds = array<i64: 2>, scalar_prefetch = 0 : i64, scratch_operands = 0 : i64, tpu.core_type = #tpu.core_type<tc>, window_params = [{transform_indices = @transform_0, window_bounds = array<i64: 88, 240>}, {pipeline_mode = #tpu.pipeline_mode<synchronous>, transform_indices = @transform_1, window_bounds = array<i64: 240, 80>}, {pipeline_mode = #tpu.pipeline_mode<synchronous>, transform_indices = @transform_2, window_bounds = array<i64: 1, 80>}, {transform_indices = @transform_3, window_bounds = array<i64: 88, 80>}]} {
    %c0 = arith.constant 0 : index
    %c0_0 = arith.constant 0 : index
    %0 = vector.load %arg1[%c0, %c0_0] : memref<88x240xf32, #tpu.memory_space<vmem>>, vector<88x240xf32>
    %c0_1 = arith.constant 0 : index
    %c0_2 = arith.constant 0 : index
    %1 = vector.load %arg2[%c0_1, %c0_2] : memref<240x80xf32, #tpu.memory_space<vmem>>, vector<240x80xf32>
    %cst = arith.constant dense<0.000000e+00> : vector<88x80xf32>
    %2 = tpu.matmul %0, %1, %cst {dimension_numbers = #tpu.dot_dimension_numbers<[1], [0], [0], [1], [0, 0, 1, 1], [], []>} : vector<88x240xf32>, vector<240x80xf32>, vector<88x80xf32> -> vector<88x80xf32>
    %c0_3 = arith.constant 0 : index
    %c0_4 = arith.constant 0 : index
    %3 = vector.load %arg3[%c0_3, %c0_4] : memref<1x80xf32, #tpu.memory_space<vmem>>, vector<1x80xf32>
    %4 = vector.broadcast %3 : vector<1x80xf32> to vector<88x80xf32>
    %5 = arith.addf %2, %4 : vector<88x80xf32>
    %c0_5 = arith.constant 0 : index
    %c0_6 = arith.constant 0 : index
    %6 = vector.load %arg4[%c0_5, %c0_6] : memref<88x80xf32, #tpu.memory_space<vmem>>, vector<88x80xf32>
    tpu.vector_store %arg4[%c0_5, %c0_6], %5 {strides = array<i32>} : memref<88x80xf32, #tpu.memory_space<vmem>>, vector<88x80xf32>,
    return
  }
  func.func @transform_0(%arg0: i32) -> (i32, i32) {
    %c0_i32 = arith.constant 0 : i32
    %c0_i32_0 = arith.constant 0 : i32
    return %arg0, %c0_i32 : i32, i32
  }
  func.func @transform_1(%arg0: i32) -> (i32, i32) {
    %c0_i32 = arith.constant 0 : i32
    %c0_i32_0 = arith.constant 0 : i32
    %c0_i32_1 = arith.constant 0 : i32
    return %c0_i32, %c0_i32_0 : i32, i32
  }
  func.func @transform_2(%arg0: i32) -> (i32, i32) {
    %c0_i32 = arith.constant 0 : i32
    %c0_i32_0 = arith.constant 0 : i32
    %c0_i32_1 = arith.constant 0 : i32
    return %c0_i32, %c0_i32_0 : i32, i32
  }
  func.func @transform_3(%arg0: i32) -> (i32, i32) {
    %c0_i32 = arith.constant 0 : i32
    %c0_i32_0 = arith.constant 0 : i32
    return %arg0, %c0_i32 : i32, i32
  }
}

module attributes {stable_mosaic.version = 11 : i64} {
  func.func @_kmax_kernel(%arg0: i32, %arg1: memref<4x2x1280xf32, #tpu.memory_space<vmem>>, %arg2: memref<2x1280xf32, #tpu.memory_space<vmem>>) attributes {dimension_semantics = [#tpu.dimension_semantics<arbitrary>], iteration_bounds = array<i64: 1>, scalar_prefetch = 0 : i64, scratch_operands = 0 : i64, tpu.core_type = #tpu.core_type<tc>, window_params = [{pipeline_mode = #tpu.pipeline_mode<synchronous>, transform_indices = @transform_0, window_bounds = array<i64: 4, 2, 1280>}, {pipeline_mode = #tpu.pipeline_mode<synchronous>, transform_indices = @transform_1, window_bounds = array<i64: 2, 1280>}]} {
    %c0 = arith.constant 0 : index
    %c0_0 = arith.constant 0 : index
    %c0_1 = arith.constant 0 : index
    %0 = vector.load %arg1[%c0, %c0_0, %c0_1] : memref<4x2x1280xf32, #tpu.memory_space<vmem>>, vector<4x2x1280xf32>
    %cst = arith.constant dense<0xFF800000> : vector<2x1280xf32>
    %1 = vector.multi_reduction <maximumf>, %0, %cst [0] : vector<4x2x1280xf32> to vector<2x1280xf32>
    %cst_2 = arith.constant 0.000000e+00 : f32
    %2 = vector.broadcast %cst_2 : f32 to vector<2x1280xf32>
    %3 = arith.maximumf %1, %2 : vector<2x1280xf32>
    %c0_3 = arith.constant 0 : index
    %c0_4 = arith.constant 0 : index
    %4 = vector.load %arg2[%c0_3, %c0_4] : memref<2x1280xf32, #tpu.memory_space<vmem>>, vector<2x1280xf32>
    tpu.vector_store %arg2[%c0_3, %c0_4], %3 {strides = array<i32>} : memref<2x1280xf32, #tpu.memory_space<vmem>>, vector<2x1280xf32>,
    return
  }
  func.func @transform_0(%arg0: i32) -> (i32, i32, i32) {
    %c0_i32 = arith.constant 0 : i32
    %c0_i32_0 = arith.constant 0 : i32
    %c0_i32_1 = arith.constant 0 : i32
    %c0_i32_2 = arith.constant 0 : i32
    return %c0_i32, %c0_i32_0, %c0_i32_1 : i32, i32, i32
  }
  func.func @transform_1(%arg0: i32) -> (i32, i32) {
    %c0_i32 = arith.constant 0 : i32
    %c0_i32_0 = arith.constant 0 : i32
    %c0_i32_1 = arith.constant 0 : i32
    return %c0_i32, %c0_i32_0 : i32, i32
  }
}

module attributes {stable_mosaic.version = 11 : i64} {
  func.func @_kmax_kernel(%arg0: i32, %arg1: memref<4x2x100xf32, #tpu.memory_space<vmem>>, %arg2: memref<2x100xf32, #tpu.memory_space<vmem>>) attributes {dimension_semantics = [#tpu.dimension_semantics<arbitrary>], iteration_bounds = array<i64: 1>, scalar_prefetch = 0 : i64, scratch_operands = 0 : i64, tpu.core_type = #tpu.core_type<tc>, window_params = [{pipeline_mode = #tpu.pipeline_mode<synchronous>, transform_indices = @transform_0, window_bounds = array<i64: 4, 2, 100>}, {pipeline_mode = #tpu.pipeline_mode<synchronous>, transform_indices = @transform_1, window_bounds = array<i64: 2, 100>}]} {
    %c0 = arith.constant 0 : index
    %c0_0 = arith.constant 0 : index
    %c0_1 = arith.constant 0 : index
    %0 = vector.load %arg1[%c0, %c0_0, %c0_1] : memref<4x2x100xf32, #tpu.memory_space<vmem>>, vector<4x2x100xf32>
    %cst = arith.constant dense<0xFF800000> : vector<2x100xf32>
    %1 = vector.multi_reduction <maximumf>, %0, %cst [0] : vector<4x2x100xf32> to vector<2x100xf32>
    %cst_2 = arith.constant 0.000000e+00 : f32
    %2 = vector.broadcast %cst_2 : f32 to vector<2x100xf32>
    %3 = arith.maximumf %1, %2 : vector<2x100xf32>
    %c0_3 = arith.constant 0 : index
    %c0_4 = arith.constant 0 : index
    %4 = vector.load %arg2[%c0_3, %c0_4] : memref<2x100xf32, #tpu.memory_space<vmem>>, vector<2x100xf32>
    tpu.vector_store %arg2[%c0_3, %c0_4], %3 {strides = array<i32>} : memref<2x100xf32, #tpu.memory_space<vmem>>, vector<2x100xf32>,
    return
  }
  func.func @transform_0(%arg0: i32) -> (i32, i32, i32) {
    %c0_i32 = arith.constant 0 : i32
    %c0_i32_0 = arith.constant 0 : i32
    %c0_i32_1 = arith.constant 0 : i32
    %c0_i32_2 = arith.constant 0 : i32
    return %c0_i32, %c0_i32_0, %c0_i32_1 : i32, i32, i32
  }
  func.func @transform_1(%arg0: i32) -> (i32, i32) {
    %c0_i32 = arith.constant 0 : i32
    %c0_i32_0 = arith.constant 0 : i32
    %c0_i32_1 = arith.constant 0 : i32
    return %c0_i32, %c0_i32_0 : i32, i32
  }
}

module attributes {stable_mosaic.version = 11 : i64} {
  func.func @_gemm_bias_kernel(%arg0: i32, %arg1: memref<24x320xf32, #tpu.memory_space<vmem>>, %arg2: memref<320x100xf32, #tpu.memory_space<vmem>>, %arg3: memref<1x100xf32, #tpu.memory_space<vmem>>, %arg4: memref<24x100xf32, #tpu.memory_space<vmem>>) attributes {dimension_semantics = [#tpu.dimension_semantics<parallel>], iteration_bounds = array<i64: 1>, scalar_prefetch = 0 : i64, scratch_operands = 0 : i64, tpu.core_type = #tpu.core_type<tc>, window_params = [{transform_indices = @transform_0, window_bounds = array<i64: 24, 320>}, {pipeline_mode = #tpu.pipeline_mode<synchronous>, transform_indices = @transform_1, window_bounds = array<i64: 320, 100>}, {pipeline_mode = #tpu.pipeline_mode<synchronous>, transform_indices = @transform_2, window_bounds = array<i64: 1, 100>}, {transform_indices = @transform_3, window_bounds = array<i64: 24, 100>}]} {
    %c0 = arith.constant 0 : index
    %c0_0 = arith.constant 0 : index
    %0 = vector.load %arg1[%c0, %c0_0] : memref<24x320xf32, #tpu.memory_space<vmem>>, vector<24x320xf32>
    %c0_1 = arith.constant 0 : index
    %c0_2 = arith.constant 0 : index
    %1 = vector.load %arg2[%c0_1, %c0_2] : memref<320x100xf32, #tpu.memory_space<vmem>>, vector<320x100xf32>
    %cst = arith.constant dense<0.000000e+00> : vector<24x100xf32>
    %2 = tpu.matmul %0, %1, %cst {dimension_numbers = #tpu.dot_dimension_numbers<[1], [0], [0], [1], [0, 0, 1, 1], [], []>} : vector<24x320xf32>, vector<320x100xf32>, vector<24x100xf32> -> vector<24x100xf32>
    %c0_3 = arith.constant 0 : index
    %c0_4 = arith.constant 0 : index
    %3 = vector.load %arg3[%c0_3, %c0_4] : memref<1x100xf32, #tpu.memory_space<vmem>>, vector<1x100xf32>
    %4 = vector.broadcast %3 : vector<1x100xf32> to vector<24x100xf32>
    %5 = arith.addf %2, %4 : vector<24x100xf32>
    %c0_5 = arith.constant 0 : index
    %c0_6 = arith.constant 0 : index
    %6 = vector.load %arg4[%c0_5, %c0_6] : memref<24x100xf32, #tpu.memory_space<vmem>>, vector<24x100xf32>
    tpu.vector_store %arg4[%c0_5, %c0_6], %5 {strides = array<i32>} : memref<24x100xf32, #tpu.memory_space<vmem>>, vector<24x100xf32>,
    return
  }
  func.func @transform_0(%arg0: i32) -> (i32, i32) {
    %c0_i32 = arith.constant 0 : i32
    %c0_i32_0 = arith.constant 0 : i32
    return %arg0, %c0_i32 : i32, i32
  }
  func.func @transform_1(%arg0: i32) -> (i32, i32) {
    %c0_i32 = arith.constant 0 : i32
    %c0_i32_0 = arith.constant 0 : i32
    %c0_i32_1 = arith.constant 0 : i32
    return %c0_i32, %c0_i32_0 : i32, i32
  }
  func.func @transform_2(%arg0: i32) -> (i32, i32) {
    %c0_i32 = arith.constant 0 : i32
    %c0_i32_0 = arith.constant 0 : i32
    %c0_i32_1 = arith.constant 0 : i32
    return %c0_i32, %c0_i32_0 : i32, i32
  }
  func.func @transform_3(%arg0: i32) -> (i32, i32) {
    %c0_i32 = arith.constant 0 : i32
    %c0_i32_0 = arith.constant 0 : i32
    return %arg0, %c0_i32 : i32, i32
  }
}

module attributes {stable_mosaic.version = 11 : i64} {
  func.func @_spp_kernel(%arg0: i32, %arg1: memref<2x1x1x100xf32, #tpu.memory_space<vmem>>, %arg2: memref<2x5x100xf32, #tpu.memory_space<vmem>>) attributes {dimension_semantics = [#tpu.dimension_semantics<arbitrary>], iteration_bounds = array<i64: 1>, scalar_prefetch = 0 : i64, scratch_operands = 0 : i64, tpu.core_type = #tpu.core_type<tc>, window_params = [{pipeline_mode = #tpu.pipeline_mode<synchronous>, transform_indices = @transform_0, window_bounds = array<i64: 2, 1, 1, 100>}, {pipeline_mode = #tpu.pipeline_mode<synchronous>, transform_indices = @transform_1, window_bounds = array<i64: 2, 5, 100>}]} {
    %c0 = arith.constant 0 : index
    %c0_0 = arith.constant 0 : index
    %c0_1 = arith.constant 0 : index
    %c0_2 = arith.constant 0 : index
    %0 = vector.load %arg1[%c0, %c0_0, %c0_1, %c0_2] : memref<2x1x1x100xf32, #tpu.memory_space<vmem>>, vector<2x1x1x100xf32>
    %cst = arith.constant dense<0xFF800000> : vector<2x100xf32>
    %1 = vector.multi_reduction <maximumf>, %0, %cst [1, 2] : vector<2x1x1x100xf32> to vector<2x100xf32>
    %cst_3 = arith.constant dense<0xFF800000> : vector<2x100xf32>
    %2 = vector.multi_reduction <maximumf>, %0, %cst_3 [1, 2] : vector<2x1x1x100xf32> to vector<2x100xf32>
    %cst_4 = arith.constant dense<0xFF800000> : vector<2x100xf32>
    %3 = vector.multi_reduction <maximumf>, %0, %cst_4 [1, 2] : vector<2x1x1x100xf32> to vector<2x100xf32>
    %cst_5 = arith.constant dense<0xFF800000> : vector<2x100xf32>
    %4 = vector.multi_reduction <maximumf>, %0, %cst_5 [1, 2] : vector<2x1x1x100xf32> to vector<2x100xf32>
    %cst_6 = arith.constant dense<0xFF800000> : vector<2x100xf32>
    %5 = vector.multi_reduction <maximumf>, %0, %cst_6 [1, 2] : vector<2x1x1x100xf32> to vector<2x100xf32>
    %6 = vector.shape_cast %1 : vector<2x100xf32> to vector<2x1x100xf32>
    %7 = vector.shape_cast %2 : vector<2x100xf32> to vector<2x1x100xf32>
    %8 = vector.shape_cast %3 : vector<2x100xf32> to vector<2x1x100xf32>
    %9 = vector.shape_cast %4 : vector<2x100xf32> to vector<2x1x100xf32>
    %10 = vector.shape_cast %5 : vector<2x100xf32> to vector<2x1x100xf32>
    %11 = tpu.concatenate %6, %7, %8, %9, %10 in 1 : vector<2x1x100xf32>, vector<2x1x100xf32>, vector<2x1x100xf32>, vector<2x1x100xf32>, vector<2x1x100xf32> -> vector<2x5x100xf32>
    %c0_7 = arith.constant 0 : index
    %c0_8 = arith.constant 0 : index
    %c0_9 = arith.constant 0 : index
    %12 = vector.load %arg2[%c0_7, %c0_8, %c0_9] : memref<2x5x100xf32, #tpu.memory_space<vmem>>, vector<2x5x100xf32>
    tpu.vector_store %arg2[%c0_7, %c0_8, %c0_9], %11 {strides = array<i32>} : memref<2x5x100xf32, #tpu.memory_space<vmem>>, vector<2x5x100xf32>,
    return
  }
  func.func @transform_0(%arg0: i32) -> (i32, i32, i32, i32) {
    %c0_i32 = arith.constant 0 : i32
    %c0_i32_0 = arith.constant 0 : i32
    %c0_i32_1 = arith.constant 0 : i32
    %c0_i32_2 = arith.constant 0 : i32
    %c0_i32_3 = arith.constant 0 : i32
    return %c0_i32, %c0_i32_0, %c0_i32_1, %c0_i32_2 : i32, i32, i32, i32
  }
  func.func @transform_1(%arg0: i32) -> (i32, i32, i32) {
    %c0_i32 = arith.constant 0 : i32
    %c0_i32_0 = arith.constant 0 : i32
    %c0_i32_1 = arith.constant 0 : i32
    %c0_i32_2 = arith.constant 0 : i32
    return %c0_i32, %c0_i32_0, %c0_i32_1 : i32, i32, i32
  }
}

module attributes {stable_mosaic.version = 11 : i64} {
  func.func @_gemm_bias_kernel(%arg0: i32, %arg1: memref<8x500xf32, #tpu.memory_space<vmem>>, %arg2: memref<500x150xf32, #tpu.memory_space<vmem>>, %arg3: memref<1x150xf32, #tpu.memory_space<vmem>>, %arg4: memref<8x150xf32, #tpu.memory_space<vmem>>) attributes {dimension_semantics = [#tpu.dimension_semantics<parallel>], iteration_bounds = array<i64: 1>, scalar_prefetch = 0 : i64, scratch_operands = 0 : i64, tpu.core_type = #tpu.core_type<tc>, window_params = [{transform_indices = @transform_0, window_bounds = array<i64: 8, 500>}, {pipeline_mode = #tpu.pipeline_mode<synchronous>, transform_indices = @transform_1, window_bounds = array<i64: 500, 150>}, {pipeline_mode = #tpu.pipeline_mode<synchronous>, transform_indices = @transform_2, window_bounds = array<i64: 1, 150>}, {transform_indices = @transform_3, window_bounds = array<i64: 8, 150>}]} {
    %c0 = arith.constant 0 : index
    %c0_0 = arith.constant 0 : index
    %0 = vector.load %arg1[%c0, %c0_0] : memref<8x500xf32, #tpu.memory_space<vmem>>, vector<8x500xf32>
    %c0_1 = arith.constant 0 : index
    %c0_2 = arith.constant 0 : index
    %1 = vector.load %arg2[%c0_1, %c0_2] : memref<500x150xf32, #tpu.memory_space<vmem>>, vector<500x150xf32>
    %cst = arith.constant dense<0.000000e+00> : vector<8x150xf32>
    %2 = tpu.matmul %0, %1, %cst {dimension_numbers = #tpu.dot_dimension_numbers<[1], [0], [0], [1], [0, 0, 1, 1], [], []>} : vector<8x500xf32>, vector<500x150xf32>, vector<8x150xf32> -> vector<8x150xf32>
    %c0_3 = arith.constant 0 : index
    %c0_4 = arith.constant 0 : index
    %3 = vector.load %arg3[%c0_3, %c0_4] : memref<1x150xf32, #tpu.memory_space<vmem>>, vector<1x150xf32>
    %4 = vector.broadcast %3 : vector<1x150xf32> to vector<8x150xf32>
    %5 = arith.addf %2, %4 : vector<8x150xf32>
    %cst_5 = arith.constant 0.000000e+00 : f32
    %6 = vector.broadcast %cst_5 : f32 to vector<8x150xf32>
    %7 = arith.maximumf %5, %6 : vector<8x150xf32>
    %c0_6 = arith.constant 0 : index
    %c0_7 = arith.constant 0 : index
    %8 = vector.load %arg4[%c0_6, %c0_7] : memref<8x150xf32, #tpu.memory_space<vmem>>, vector<8x150xf32>
    tpu.vector_store %arg4[%c0_6, %c0_7], %7 {strides = array<i32>} : memref<8x150xf32, #tpu.memory_space<vmem>>, vector<8x150xf32>,
    return
  }
  func.func @transform_0(%arg0: i32) -> (i32, i32) {
    %c0_i32 = arith.constant 0 : i32
    %c0_i32_0 = arith.constant 0 : i32
    return %arg0, %c0_i32 : i32, i32
  }
  func.func @transform_1(%arg0: i32) -> (i32, i32) {
    %c0_i32 = arith.constant 0 : i32
    %c0_i32_0 = arith.constant 0 : i32
    %c0_i32_1 = arith.constant 0 : i32
    return %c0_i32, %c0_i32_0 : i32, i32
  }
  func.func @transform_2(%arg0: i32) -> (i32, i32) {
    %c0_i32 = arith.constant 0 : i32
    %c0_i32_0 = arith.constant 0 : i32
    %c0_i32_1 = arith.constant 0 : i32
    return %c0_i32, %c0_i32_0 : i32, i32
  }
  func.func @transform_3(%arg0: i32) -> (i32, i32) {
    %c0_i32 = arith.constant 0 : i32
    %c0_i32_0 = arith.constant 0 : i32
    return %arg0, %c0_i32 : i32, i32
  }
}

module attributes {stable_mosaic.version = 11 : i64} {
  func.func @_gemm_bias_kernel(%arg0: i32, %arg1: memref<8x150xf32, #tpu.memory_space<vmem>>, %arg2: memref<150x10xf32, #tpu.memory_space<vmem>>, %arg3: memref<1x10xf32, #tpu.memory_space<vmem>>, %arg4: memref<8x10xf32, #tpu.memory_space<vmem>>) attributes {dimension_semantics = [#tpu.dimension_semantics<parallel>], iteration_bounds = array<i64: 1>, scalar_prefetch = 0 : i64, scratch_operands = 0 : i64, tpu.core_type = #tpu.core_type<tc>, window_params = [{transform_indices = @transform_0, window_bounds = array<i64: 8, 150>}, {pipeline_mode = #tpu.pipeline_mode<synchronous>, transform_indices = @transform_1, window_bounds = array<i64: 150, 10>}, {pipeline_mode = #tpu.pipeline_mode<synchronous>, transform_indices = @transform_2, window_bounds = array<i64: 1, 10>}, {transform_indices = @transform_3, window_bounds = array<i64: 8, 10>}]} {
    %c0 = arith.constant 0 : index
    %c0_0 = arith.constant 0 : index
    %0 = vector.load %arg1[%c0, %c0_0] : memref<8x150xf32, #tpu.memory_space<vmem>>, vector<8x150xf32>
    %c0_1 = arith.constant 0 : index
    %c0_2 = arith.constant 0 : index
    %1 = vector.load %arg2[%c0_1, %c0_2] : memref<150x10xf32, #tpu.memory_space<vmem>>, vector<150x10xf32>
    %cst = arith.constant dense<0.000000e+00> : vector<8x10xf32>
    %2 = tpu.matmul %0, %1, %cst {dimension_numbers = #tpu.dot_dimension_numbers<[1], [0], [0], [1], [0, 0, 1, 1], [], []>} : vector<8x150xf32>, vector<150x10xf32>, vector<8x10xf32> -> vector<8x10xf32>
    %c0_3 = arith.constant 0 : index
    %c0_4 = arith.constant 0 : index
    %3 = vector.load %arg3[%c0_3, %c0_4] : memref<1x10xf32, #tpu.memory_space<vmem>>, vector<1x10xf32>
    %4 = vector.broadcast %3 : vector<1x10xf32> to vector<8x10xf32>
    %5 = arith.addf %2, %4 : vector<8x10xf32>
    %cst_5 = arith.constant dense<0xFF800000> : vector<8xf32>
    %6 = vector.multi_reduction <maximumf>, %5, %cst_5 [1] : vector<8x10xf32> to vector<8xf32>
    %7 = vector.shape_cast %6 : vector<8xf32> to vector<8x1xf32>
    %8 = vector.broadcast %7 : vector<8x1xf32> to vector<8x10xf32>
    %9 = arith.subf %5, %8 : vector<8x10xf32>
    %10 = math.exp %9 : vector<8x10xf32>
    %cst_6 = arith.constant dense<0.000000e+00> : vector<8xf32>
    %11 = vector.multi_reduction <add>, %10, %cst_6 [1] : vector<8x10xf32> to vector<8xf32>
    %12 = vector.shape_cast %11 : vector<8xf32> to vector<8x1xf32>
    %13 = vector.broadcast %12 : vector<8x1xf32> to vector<8x10xf32>
    %14 = arith.divf %10, %13 : vector<8x10xf32>
    %c0_7 = arith.constant 0 : index
    %c0_8 = arith.constant 0 : index
    %15 = vector.load %arg4[%c0_7, %c0_8] : memref<8x10xf32, #tpu.memory_space<vmem>>, vector<8x10xf32>
    tpu.vector_store %arg4[%c0_7, %c0_8], %14 {strides = array<i32>} : memref<8x10xf32, #tpu.memory_space<vmem>>, vector<8x10xf32>,
    return
  }
  func.func @transform_0(%arg0: i32) -> (i32, i32) {
    %c0_i32 = arith.constant 0 : i32
    %c0_i32_0 = arith.constant 0 : i32
    return %arg0, %c0_i32 : i32, i32
  }
  func.func @transform_1(%arg0: i32) -> (i32, i32) {
    %c0_i32 = arith.constant 0 : i32
    %c0_i32_0 = arith.constant 0 : i32
    %c0_i32_1 = arith.constant 0 : i32
    return %c0_i32, %c0_i32_0 : i32, i32
  }
  func.func @transform_2(%arg0: i32) -> (i32, i32) {
    %c0_i32 = arith.constant 0 : i32
    %c0_i32_0 = arith.constant 0 : i32
    %c0_i32_1 = arith.constant 0 : i32
    return %c0_i32, %c0_i32_0 : i32, i32
  }
  func.func @transform_3(%arg0: i32) -> (i32, i32) {
    %c0_i32 = arith.constant 0 : i32
    %c0_i32_0 = arith.constant 0 : i32
    return %arg0, %c0_i32 : i32, i32
  }
}

</mosaic_0001>

<bundles_post_ra>
// kernel: model_forward.10
= control target key start
LH: loop header
LB: loop body
LE: loop exit
PB: predicated region body
PF: predicated region fallthrough
CT: control target
= control target key end

     0   :  { %vm34_vm0 = vcmask 1041408   ;;  %vm35_vm1 = vcmask 1043458   ;;  %s152_s0 = inlined_call_operand.vmem [shape: f32[9,2,768], index: 0, kind: input, shape index: {}]   ;;  %s153_s1 = inlined_call_operand.vmem [shape: f32[2,768], index: 1, kind: output, shape index: {}]  }
   0x1   :  { %v8_v0 = vld [vmem:[%s152_s0] sm:$0xff]  ;;  %v10_v1 = vld [vmem:[%s152_s0 + $0xc] sm:$0xff]  ;;  %v12_v2 = vld [vmem:[%s152_s0 + $0x18] sm:$0xff] }
   0x2   :  { %v14_v3 = vld [vmem:[%s152_s0 + $0x24] sm:$0xff]  ;;  %v16_v4 = vld [vmem:[%s152_s0 + $0x30] sm:$0xff]  ;;  %v18_v5 = vld [vmem:[%s152_s0 + $0x3c] sm:$0xff]  ;;  %v26_v6 = vmax.f32 %v8_v0, %v12_v2 }
   0x3   :  { %v20_v7 = vld [vmem:[%s152_s0 + $0x48] sm:$0xff]  ;;  %v27_v8 = vmax.f32 %v10_v1, %v14_v3  ;;  %v22_v9 = vld [vmem:[%s152_s0 + $0x54] sm:$0xff]  ;;  %v24_v10 = vld [vmem:[%s152_s0 + $0x60] sm:$0xff] }
   0x4   :  { %v28_v11 = vmax.f32 %v26_v6, %v16_v4  ;;  %v9_v13 = vld [vmem:[%s152_s0 + $0x8] sm:$0xf]  ;;  %v11_v14 = vld [vmem:[%s152_s0 + $0x14] sm:$0xf]  ;;  %v13_v15 = vld [vmem:[%s152_s0 + $0x20] sm:$0xf] }
   0x5   :  { %v29_v12 = vmax.f32 %v27_v8, %v18_v5  ;;  %v15_v17 = vld [vmem:[%s152_s0 + $0x2c] sm:$0xf]  ;;  %v17_v18 = vld [vmem:[%s152_s0 + $0x38] sm:$0xf]  ;;  %v19_v19 = vld [vmem:[%s152_s0 + $0x44] sm:$0xf] }
   0x6   :  { %v30_v16 = vmax.f32 %v28_v11, %v20_v7  ;;  %v21_v21 = vld [vmem:[%s152_s0 + $0x50] sm:$0xf]  ;;  %vm118_vm2 = vmor %vm35_vm1, %vm34_vm0  ;;  %v23_v24 = vld [vmem:[%s152_s0 + $0x5c] sm:$0xf] }
   0x7   :  { %v31_v20 = vmax.f32 %v29_v12, %v22_v9  ;;  %v37_v25 = vsel %vm118_vm2, %v9_v13, -inf  ;;  %v38_v26 = vsel %vm118_vm2, %v11_v14, -inf  ;;  %v39_v27 = vsel %vm118_vm2, %v13_v15, -inf  ;;  %v25_v28 = vld [vmem:[%s152_s0 + $0x68] sm:$0xf] }
   0x8   :  { %v32_v23 = vmax.f32 %v30_v16, %v24_v10  ;;  %v40_v29 = vmax.f32 %v37_v25, %v39_v27  ;;  %v41_v30 = vsel %vm118_vm2, %v15_v17, -inf  ;;  %v43_v31 = vsel %vm118_vm2, %v17_v18, -inf }
   0x9   :  { %v45_v32 = vsel %vm118_vm2, %v19_v19, -inf  ;;  %v42_v34 = vmax.f32 %v38_v26, %v41_v30  ;;  %v47_v35 = vsel %vm118_vm2, %v21_v21, -inf  ;;  %v49_v37 = vsel %vm118_vm2, %v23_v24, -inf }
   0xa   :  { %v33_v33 = vmax.f32 %v32_v23, %v31_v20  ;;  %v44_v36 = vmax.f32 %v40_v29, %v43_v31  ;;  %v51_v39 = vsel %vm118_vm2, %v25_v28, -inf }
   0xb   :  { %v46_v38 = vmax.f32 %v42_v34, %v45_v32 }
   0xc   :  { %54 = vst [vmem:[%s153_s1] sm:$0xff] %v33_v33  ;;  %v48_v40 = vmax.f32 %v44_v36, %v47_v35 }
   0xd   :  { %v50_v41 = vmax.f32 %v46_v38, %v49_v37 }
   0xe   :  { %v52_v42 = vmax.f32 %v48_v40, %v51_v39 }
  0x10   :  { %v53_v43 = vmax.f32 %v52_v42, %v50_v41 }
  0x12   :  { %55 = vst [vmem:[%s153_s1 + $0x8] sm:$0xf] %v53_v43 }

// kernel: model_forward.11
= control target key start
LH: loop header
LB: loop body
LE: loop exit
PB: predicated region body
PF: predicated region fallthrough
CT: control target
= control target key end

     0   :  { %s827_s12 = smov 0   ;;  %s1023_s0 = inlined_call_operand.vmem [shape: f32[512,6], index: 0, kind: input, shape index: {}]   ;;  %s1024_s1 = inlined_call_operand.vmem [shape: f32[6,40], index: 1, kind: input, shape index: {}]   ;;  %s1025_s2 = inlined_call_operand.vmem [shape: f32[1,40], index: 2, kind: input, shape index: {}]   ;;  %s1026_s3 = inlined_call_operand.vmem [shape: f32[512,40], index: 3, kind: output, shape index: {}]  }
   0x1 LB: > { %s661_s13 = sadd.s32 4294967295, %s805_s12   ;;  %p665_p0 = scmp.ge.s32.totalorder %s805_s12, 1  ;;  %s805_s12 = sphi %s827_s12, %s13_s12  }
   0x2   : > { %p138_p1 = scmp.lt.s32.totalorder %s805_s12, 3 }
   0x4   : > { %p139_p2 = pnand %p665_p0, %p138_p1 }
   0x5   : > { %v206_v0 = vld [vmem:[%s1024_s1] sm:$0x3f] (!%p139_p2)  ;;  %vm311_vm0 = vcmask (!%p139_p2), 1045504   ;;  %s666_s16 = sshll.u32 (!%p139_p2), %s661_s13, 5  ;;  %vm214_vm1 = vcmask (!%p139_p2), 48128   ;;  %vm572_vm2 = vcmask (!%p139_p2), 326656  }
   0x6   : > { %142 = sbr.rel (%p139_p2) target bundleno = 265 (0x109), region = 32  ;;  %739 = vmatprep.subr.msk.mxu0 (!%p139_p2), %vm311_vm0, %v206_v0  ;;  %789 = vmatprep.subr.msk.mxu1 (!%p139_p2), %vm311_vm0, %v206_v0  ;;  %p163_p3 = scmp.lt.s32.totalorder (!%p139_p2), %s666_s16, 63  ;;  %v915_v33 = vld [vmem:[%s1025_s2] ss:$0 sm:$0xff] (!%p139_p2) }
   0x7   : > { %740 = vmatpush3.msk.msra.mxu0 (!%p139_p2), %vm311_vm0, %v206_v0  ;;  %790 = vmatpush3.msk.msra.mxu1 (!%p139_p2), %vm311_vm0, %v206_v0 }
   0xd   : > { %s1028_s16 = smov (!%p163_p3, %s666_s16), 63 }
   0xe   : > { %s667_s17 = sshll.u32 %s1028_s16, 3 }
   0xf   : > { %s846_s20 = scalar_lea.vmem %s1023_s0, %s667_s17  ;;  %s924_s25 = scalar_lea.vmem %s1026_s3, %s667_s17 }
  0x10   : > { %v174_v1 = vld [vmem:[%s846_s20] sm:$0xff]  ;;  %v175_v3 = vld [vmem:[%s846_s20 + $0x8] sm:$0xff]  ;;  %v176_v5 = vld [vmem:[%s846_s20 + $0x10] sm:$0xff] }
  0x11   : > { %v190_v2 = vld [vmem:[%s846_s20 + $0x80] sm:$0xff]  ;;  %741 = vmatprep.mubr.msk.f32.mxu0 %vm214_vm1, %v174_v1  ;;  %v191_v4 = vld [vmem:[%s846_s20 + $0x88] sm:$0xff]  ;;  %v192_v6 = vld [vmem:[%s846_s20 + $0x90] sm:$0xff] }
  0x12   : > { %765 = vmatprep.mubr.msk.f32.mxu1 %vm214_vm1, %v190_v2  ;;  %742 = vmatmul.mubr.msk.f32.vlgmr.msra.gmra.mrb[0].mxu0 %vm214_vm1, %v175_v3  ;;  %v177_v7 = vld [vmem:[%s846_s20 + $0x18] sm:$0xff]  ;;  %v178_v9 = vld [vmem:[%s846_s20 + $0x20] sm:$0xff]  ;;  %v179_v11 = vld [vmem:[%s846_s20 + $0x28] sm:$0xff] }
  0x13   : > { %766 = vmatmul.mubr.msk.f32.vlgmr.msra.gmra.mrb[0].mxu1 %vm214_vm1, %v191_v4  ;;  %744 = vmatprep.mubr.msk.f32.mxu0 %vm214_vm1, %v176_v5  ;;  %v193_v8 = vld [vmem:[%s846_s20 + $0x98] sm:$0xff]  ;;  %v194_v10 = vld [vmem:[%s846_s20 + $0xa0] sm:$0xff]  ;;  %v195_v12 = vld [vmem:[%s846_s20 + $0xa8] sm:$0xff] }
  0x14   : > { %768 = vmatprep.mubr.msk.f32.mxu1 %vm214_vm1, %v192_v6  ;;  %v180_v13 = vld [vmem:[%s846_s20 + $0x30] sm:$0xff]  ;;  %v181_v15 = vld [vmem:[%s846_s20 + $0x38] sm:$0xff]  ;;  %v182_v17 = vld [vmem:[%s846_s20 + $0x40] sm:$0xff] }
  0x15   : > { %v196_v14 = vld [vmem:[%s846_s20 + $0xb0] sm:$0xff]  ;;  %v197_v16 = vld [vmem:[%s846_s20 + $0xb8] sm:$0xff]  ;;  %v198_v18 = vld [vmem:[%s846_s20 + $0xc0] sm:$0xff] }
  0x16   : > { %745 = vmatmul.mubr.msk.f32.gmra.mrb[2].mxu0 %vm214_vm1, %v177_v7  ;;  %v183_v19 = vld [vmem:[%s846_s20 + $0x48] sm:$0xff]  ;;  %v184_v21 = vld [vmem:[%s846_s20 + $0x50] sm:$0xff]  ;;  %v185_v23 = vld [vmem:[%s846_s20 + $0x58] sm:$0xff] }
  0x17   : > { %769 = vmatmul.mubr.msk.f32.gmra.mrb[2].mxu1 %vm214_vm1, %v193_v8  ;;  %747 = vmatprep.mubr.msk.f32.mxu0 %vm214_vm1, %v178_v9  ;;  %v199_v20 = vld [vmem:[%s846_s20 + $0xc8] sm:$0xff]  ;;  %v200_v22 = vld [vmem:[%s846_s20 + $0xd0] sm:$0xff]  ;;  %v201_v24 = vld [vmem:[%s846_s20 + $0xd8] sm:$0xff] }
  0x18   : > { %771 = vmatprep.mubr.msk.f32.mxu1 %vm214_vm1, %v194_v10  ;;  %v186_v25 = vld [vmem:[%s846_s20 + $0x60] sm:$0xff]  ;;  %v187_v27 = vld [vmem:[%s846_s20 + $0x68] sm:$0xff]  ;;  %v188_v29 = vld [vmem:[%s846_s20 + $0x70] sm:$0xff] }
  0x19   : > { %v202_v26 = vld [vmem:[%s846_s20 + $0xe0] sm:$0xff]  ;;  %v203_v28 = vld [vmem:[%s846_s20 + $0xe8] sm:$0xff]  ;;  %v204_v30 = vld [vmem:[%s846_s20 + $0xf0] sm:$0xff] }
  0x1a   : > { %748 = vmatmul.mubr.msk.f32.gmra.mrb[4].mxu0 %vm214_vm1, %v179_v11  ;;  %v189_v31 = vld [vmem:[%s846_s20 + $0x78] sm:$0xff] }
  0x1b   : > { %772 = vmatmul.mubr.msk.f32.gmra.mrb[4].mxu1 %vm214_vm1, %v195_v12  ;;  %750 = vmatprep.mubr.msk.f32.mxu0 %vm214_vm1, %v180_v13  ;;  %v205_v32 = vld [vmem:[%s846_s20 + $0xf8] sm:$0xff] }
  0x1c   : > { %774 = vmatprep.mubr.msk.f32.mxu1 %vm214_vm1, %v196_v14 }
  0x1e   : > { %751 = vmatmul.mubr.msk.f32.gmra.mrb[6].mxu0 %vm214_vm1, %v181_v15 }
  0x1f   : > { %775 = vmatmul.mubr.msk.f32.gmra.mrb[6].mxu1 %vm214_vm1, %v197_v16  ;;  %753 = vmatprep.mubr.msk.f32.mxu0 %vm214_vm1, %v182_v17 }
  0x20   : > { %777 = vmatprep.mubr.msk.f32.mxu1 %vm214_vm1, %v198_v18 }
  0x22   : > { %754 = vmatmul.mubr.msk.f32.gmra.mrb[8].mxu0 %vm214_vm1, %v183_v19 }
  0x23   : > { %778 = vmatmul.mubr.msk.f32.gmra.mrb[8].mxu1 %vm214_vm1, %v199_v20  ;;  %756 = vmatprep.mubr.msk.f32.mxu0 %vm214_vm1, %v184_v21 }
  0x24   : > { %780 = vmatprep.mubr.msk.f32.mxu1 %vm214_vm1, %v200_v22 }
  0x26   : > { %757 = vmatmul.mubr.msk.f32.gmra.mrb[10].mxu0 %vm214_vm1, %v185_v23 }
  0x27   : > { %781 = vmatmul.mubr.msk.f32.gmra.mrb[10].mxu1 %vm214_vm1, %v201_v24  ;;  %759 = vmatprep.mubr.msk.f32.mxu0 %vm214_vm1, %v186_v25 }
  0x28   : > { %783 = vmatprep.mubr.msk.f32.mxu1 %vm214_vm1, %v202_v26 }
  0x2a   : > { %760 = vmatmul.mubr.msk.f32.gmra.mrb[12].mxu0 %vm214_vm1, %v187_v27 }
  0x2b   : > { %784 = vmatmul.mubr.msk.f32.gmra.mrb[12].mxu1 %vm214_vm1, %v203_v28  ;;  %762 = vmatprep.mubr.msk.f32.mxu0 %vm214_vm1, %v188_v29 }
  0x2c   : > { %786 = vmatprep.mubr.msk.f32.mxu1 %vm214_vm1, %v204_v30 }
  0x2e   : > { %763 = vmatmul.mubr.msk.f32.gmra.mrb[14].mxu0 %vm214_vm1, %v189_v31 }
  0x2f   : > { %787 = vmatmul.mubr.msk.f32.gmra.mrb[14].mxu1 %vm214_vm1, %v205_v32 }
  0xe5   : > { %v743_v34 = vpop.f32.mrb[0].mxu0 }
  0xe6   : > { %v767_v35 = vpop.f32.mrb[0].mxu1  ;;  %v387_v36 = vadd.f32 %v743_v34, %v915_v33  ;;  %v381_v38 = vpop.f32.mrb[1].mxu0 }
  0xe7   : > { %v467_v37 = vadd.f32 %v767_v35, %v915_v33  ;;  %v461_v39 = vpop.f32.mrb[1].mxu1  ;;  %v382_v40 = vadd.f32 %v915_v33, %v381_v38 }
  0xe8   : > { %v462_v41 = vadd.f32 %v915_v33, %v461_v39  ;;  %v541_v42 = vmax.f32 %v387_v36, 0.0 }
  0xe9   : > { %v557_v43 = vmax.f32 %v467_v37, 0.0  ;;  %v540_v44 = vmax.f32 %v382_v40, 0.0  ;;  %v746_v46 = vpop.f32.mrb[2].mxu0 }
  0xea   : > { %v556_v45 = vmax.f32 %v462_v41, 0.0  ;;  %v770_v47 = vpop.f32.mrb[2].mxu1  ;;  %574 = vst.msk [vmem:[%s924_s25 + $0x8] sm:$0xff] %vm572_vm2, %v541_v42  ;;  %v397_v48 = vadd.f32 %v746_v46, %v915_v33  ;;  %v391_v50 = vpop.f32.mrb[3].mxu0 }
  0xeb   : > { %590 = vst.msk [vmem:[%s924_s25 + $0x88] sm:$0xff] %vm572_vm2, %v557_v43  ;;  %v477_v49 = vadd.f32 %v770_v47, %v915_v33  ;;  %v471_v51 = vpop.f32.mrb[3].mxu1  ;;  %573 = vst.msk [vmem:[%s924_s25] sm:$0xff] %vm572_vm2, %v540_v44  ;;  %v392_v52 = vadd.f32 %v915_v33, %v391_v50 }
  0xec   : > { %589 = vst.msk [vmem:[%s924_s25 + $0x80] sm:$0xff] %vm572_vm2, %v556_v45  ;;  %v472_v53 = vadd.f32 %v915_v33, %v471_v51  ;;  %v543_v54 = vmax.f32 %v397_v48, 0.0 }
  0xed   : > { %v559_v55 = vmax.f32 %v477_v49, 0.0  ;;  %v542_v56 = vmax.f32 %v392_v52, 0.0  ;;  %v749_v58 = vpop.f32.mrb[4].mxu0 }
  0xee   : > { %v558_v57 = vmax.f32 %v472_v53, 0.0  ;;  %v773_v59 = vpop.f32.mrb[4].mxu1  ;;  %576 = vst.msk [vmem:[%s924_s25 + $0x18] sm:$0xff] %vm572_vm2, %v543_v54  ;;  %v407_v60 = vadd.f32 %v749_v58, %v915_v33  ;;  %v401_v62 = vpop.f32.mrb[5].mxu0 }
  0xef   : > { %592 = vst.msk [vmem:[%s924_s25 + $0x98] sm:$0xff] %vm572_vm2, %v559_v55  ;;  %v487_v61 = vadd.f32 %v773_v59, %v915_v33  ;;  %v481_v63 = vpop.f32.mrb[5].mxu1  ;;  %575 = vst.msk [vmem:[%s924_s25 + $0x10] sm:$0xff] %vm572_vm2, %v542_v56  ;;  %v402_v0 = vadd.f32 %v915_v33, %v401_v62 }
  0xf0   : > { %591 = vst.msk [vmem:[%s924_s25 + $0x90] sm:$0xff] %vm572_vm2, %v558_v57  ;;  %v482_v1 = vadd.f32 %v915_v33, %v481_v63  ;;  %v545_v2 = vmax.f32 %v407_v60, 0.0 }
  0xf1   : > { %v561_v3 = vmax.f32 %v487_v61, 0.0  ;;  %v544_v4 = vmax.f32 %v402_v0, 0.0  ;;  %v752_v6 = vpop.f32.mrb[6].mxu0 }
  0xf2   : > { %v560_v5 = vmax.f32 %v482_v1, 0.0  ;;  %v776_v7 = vpop.f32.mrb[6].mxu1  ;;  %578 = vst.msk [vmem:[%s924_s25 + $0x28] sm:$0xff] %vm572_vm2, %v545_v2  ;;  %v417_v8 = vadd.f32 %v752_v6, %v915_v33  ;;  %v411_v10 = vpop.f32.mrb[7].mxu0 }
  0xf3   : > { %594 = vst.msk [vmem:[%s924_s25 + $0xa8] sm:$0xff] %vm572_vm2, %v561_v3  ;;  %v497_v9 = vadd.f32 %v776_v7, %v915_v33  ;;  %v491_v11 = vpop.f32.mrb[7].mxu1  ;;  %577 = vst.msk [vmem:[%s924_s25 + $0x20] sm:$0xff] %vm572_vm2, %v544_v4  ;;  %v412_v12 = vadd.f32 %v915_v33, %v411_v10 }
  0xf4   : > { %593 = vst.msk [vmem:[%s924_s25 + $0xa0] sm:$0xff] %vm572_vm2, %v560_v5  ;;  %v492_v13 = vadd.f32 %v915_v33, %v491_v11  ;;  %v547_v14 = vmax.f32 %v417_v8, 0.0 }
  0xf5   : > { %v563_v15 = vmax.f32 %v497_v9, 0.0  ;;  %v546_v16 = vmax.f32 %v412_v12, 0.0  ;;  %v755_v18 = vpop.f32.mrb[8].mxu0 }
  0xf6   : > { %v562_v17 = vmax.f32 %v492_v13, 0.0  ;;  %v779_v19 = vpop.f32.mrb[8].mxu1  ;;  %580 = vst.msk [vmem:[%s924_s25 + $0x38] sm:$0xff] %vm572_vm2, %v547_v14  ;;  %v427_v20 = vadd.f32 %v755_v18, %v915_v33  ;;  %v421_v22 = vpop.f32.mrb[9].mxu0 }
  0xf7   : > { %596 = vst.msk [vmem:[%s924_s25 + $0xb8] sm:$0xff] %vm572_vm2, %v563_v15  ;;  %v507_v21 = vadd.f32 %v779_v19, %v915_v33  ;;  %v501_v23 = vpop.f32.mrb[9].mxu1  ;;  %579 = vst.msk [vmem:[%s924_s25 + $0x30] sm:$0xff] %vm572_vm2, %v546_v16  ;;  %v422_v24 = vadd.f32 %v915_v33, %v421_v22 }
  0xf8   : > { %595 = vst.msk [vmem:[%s924_s25 + $0xb0] sm:$0xff] %vm572_vm2, %v562_v17  ;;  %v502_v25 = vadd.f32 %v915_v33, %v501_v23  ;;  %v549_v26 = vmax.f32 %v427_v20, 0.0 }
  0xf9   : > { %v565_v27 = vmax.f32 %v507_v21, 0.0  ;;  %v548_v28 = vmax.f32 %v422_v24, 0.0  ;;  %v758_v30 = vpop.f32.mrb[10].mxu0 }
  0xfa   : > { %v564_v29 = vmax.f32 %v502_v25, 0.0  ;;  %v782_v31 = vpop.f32.mrb[10].mxu1  ;;  %582 = vst.msk [vmem:[%s924_s25 + $0x48] sm:$0xff] %vm572_vm2, %v549_v26  ;;  %v437_v32 = vadd.f32 %v758_v30, %v915_v33  ;;  %v431_v35 = vpop.f32.mrb[11].mxu0 }
  0xfb   : > { %598 = vst.msk [vmem:[%s924_s25 + $0xc8] sm:$0xff] %vm572_vm2, %v565_v27  ;;  %v517_v34 = vadd.f32 %v782_v31, %v915_v33  ;;  %v511_v36 = vpop.f32.mrb[11].mxu1  ;;  %581 = vst.msk [vmem:[%s924_s25 + $0x40] sm:$0xff] %vm572_vm2, %v548_v28  ;;  %v432_v37 = vadd.f32 %v915_v33, %v431_v35 }
  0xfc   : > { %597 = vst.msk [vmem:[%s924_s25 + $0xc0] sm:$0xff] %vm572_vm2, %v564_v29  ;;  %v512_v38 = vadd.f32 %v915_v33, %v511_v36  ;;  %v551_v39 = vmax.f32 %v437_v32, 0.0 }
  0xfd   : > { %v567_v40 = vmax.f32 %v517_v34, 0.0  ;;  %v550_v41 = vmax.f32 %v432_v37, 0.0  ;;  %v761_v43 = vpop.f32.mrb[12].mxu0 }
  0xfe   : > { %v566_v42 = vmax.f32 %v512_v38, 0.0  ;;  %v785_v44 = vpop.f32.mrb[12].mxu1  ;;  %584 = vst.msk [vmem:[%s924_s25 + $0x58] sm:$0xff] %vm572_vm2, %v551_v39  ;;  %v447_v45 = vadd.f32 %v761_v43, %v915_v33  ;;  %v441_v47 = vpop.f32.mrb[13].mxu0 }
  0xff   : > { %600 = vst.msk [vmem:[%s924_s25 + $0xd8] sm:$0xff] %vm572_vm2, %v567_v40  ;;  %v527_v46 = vadd.f32 %v785_v44, %v915_v33  ;;  %v521_v48 = vpop.f32.mrb[13].mxu1  ;;  %583 = vst.msk [vmem:[%s924_s25 + $0x50] sm:$0xff] %vm572_vm2, %v550_v41  ;;  %v442_v49 = vadd.f32 %v915_v33, %v441_v47 }
 0x100   : > { %599 = vst.msk [vmem:[%s924_s25 + $0xd0] sm:$0xff] %vm572_vm2, %v566_v42  ;;  %v522_v50 = vadd.f32 %v915_v33, %v521_v48  ;;  %v553_v51 = vmax.f32 %v447_v45, 0.0 }
 0x101   : > { %v569_v52 = vmax.f32 %v527_v46, 0.0  ;;  %v552_v53 = vmax.f32 %v442_v49, 0.0  ;;  %v764_v55 = vpop.f32.mrb[14].mxu0 }
 0x102   : > { %v568_v54 = vmax.f32 %v522_v50, 0.0  ;;  %v788_v56 = vpop.f32.mrb[14].mxu1  ;;  %586 = vst.msk [vmem:[%s924_s25 + $0x68] sm:$0xff] %vm572_vm2, %v553_v51  ;;  %v457_v57 = vadd.f32 %v764_v55, %v915_v33  ;;  %v451_v59 = vpop.f32.mrb[15].mxu0 }
 0x103   : > { %602 = vst.msk [vmem:[%s924_s25 + $0xe8] sm:$0xff] %vm572_vm2, %v569_v52  ;;  %v537_v58 = vadd.f32 %v788_v56, %v915_v33  ;;  %v531_v60 = vpop.f32.mrb[15].mxu1  ;;  %585 = vst.msk [vmem:[%s924_s25 + $0x60] sm:$0xff] %vm572_vm2, %v552_v53  ;;  %v452_v61 = vadd.f32 %v915_v33, %v451_v59 }
 0x104   : > { %601 = vst.msk [vmem:[%s924_s25 + $0xe0] sm:$0xff] %vm572_vm2, %v568_v54  ;;  %v532_v62 = vadd.f32 %v915_v33, %v531_v60  ;;  %v555_v63 = vmax.f32 %v457_v57, 0.0 }
 0x105   : > { %v571_v0 = vmax.f32 %v537_v58, 0.0  ;;  %v554_v1 = vmax.f32 %v452_v61, 0.0 }
 0x106   : > { %v570_v2 = vmax.f32 %v532_v62, 0.0  ;;  %588 = vst.msk [vmem:[%s924_s25 + $0x78] sm:$0xff] %vm572_vm2, %v555_v63 }
 0x107   : > { %604 = vst.msk [vmem:[%s924_s25 + $0xf8] sm:$0xff] %vm572_vm2, %v571_v0  ;;  %587 = vst.msk [vmem:[%s924_s25 + $0x70] sm:$0xff] %vm572_vm2, %v554_v1 }
 0x108   : > { %603 = vst.msk [vmem:[%s924_s25 + $0xf0] sm:$0xff] %vm572_vm2, %v570_v2 }
 0x109 PF: > { %s13_s12 = sadd.s32 1, %s805_s12  }
 0x10a   : > { %p10_p4 = scmp.ge.s32.totalorder %s13_s12, 4  }
 0x10c   :  { %12 = sbr.rel (!%p10_p4) target bundleno = 1 (0x1), region = 62 }

// kernel: model_forward.12
= control target key start
LH: loop header
LB: loop body
LE: loop exit
PB: predicated region body
PF: predicated region fallthrough
CT: control target
= control target key end

     0   :  { %s862_s12 = smov 0   ;;  %s1175_s0 = inlined_call_operand.vmem [shape: f32[512,180], index: 0, kind: input, shape index: {}]   ;;  %s1176_s1 = inlined_call_operand.vmem [shape: f32[180,40], index: 1, kind: input, shape index: {}]   ;;  %s1177_s2 = inlined_call_operand.vmem [shape: f32[1,40], index: 2, kind: input, shape index: {}]   ;;  %s1178_s3 = inlined_call_operand.vmem [shape: f32[512,40], index: 3, kind: output, shape index: {}]  }
   0x1 LB: > { %s718_s13 = sadd.s32 4294967295, %s838_s12   ;;  %p722_p0 = scmp.ge.s32.totalorder %s838_s12, 1  ;;  %s838_s12 = sphi %s862_s12, %s13_s12  }
   0x2   : > { %p139_p1 = scmp.lt.s32.totalorder %s838_s12, 3 }
   0x4   : > { %p140_p2 = pnand %p722_p0, %p139_p1 }
   0x5   : > { %v241_v0 = vld [vmem:[%s1176_s1] sm:$0xff] (!%p140_p2)  ;;  %v242_v1 = vld [vmem:[%s1176_s1 + $0x8] sm:$0xff] (!%p140_p2)  ;;  %v243_v2 = vld [vmem:[%s1176_s1 + $0x10] sm:$0xff] (!%p140_p2)  ;;  %v840_v3 = vmov (!%p140_p2), 0.0|0.0   ;;  %s723_s22 = sshll.u32 (!%p140_p2), %s718_s13, 5  ;;  %vm271_vm0 = vcmask (!%p140_p2), 424960  }
   0x6   : > { %143 = sbr.rel (%p140_p2) target bundleno = 330 (0x14a), region = 32  ;;  %765 = vmatprep.subr.bf16.mxu0 (!%p140_p2), %v840_v3  ;;  %798 = vmatprep.subr.bf16.mxu1 (!%p140_p2), %v840_v3  ;;  %v766_v4 = vpack.c.bf16 (!%p140_p2), %v242_v1, %v241_v0  ;;  %v244_v5 = vld [vmem:[%s1176_s1 + $0x18] sm:$0xff] (!%p140_p2)  ;;  %p165_p3 = scmp.lt.s32.totalorder (!%p140_p2), %s723_s22, 63  ;;  %v245_v7 = vld [vmem:[%s1176_s1 + $0x20] sm:$0xff] (!%p140_p2)  ;;  %v246_v8 = vld [vmem:[%s1176_s1 + $0x28] sm:$0xff] (!%p140_p2)  ;;  %v841_v36 = vmov (!%p140_p2), 0.0  }
   0x7   : > { %v769_v6 = vpack.c.bf16 (!%p140_p2), %v244_v5, %v243_v2  ;;  %v772_v9 = vpack.c.bf16 (!%p140_p2), %v246_v8, %v245_v7  ;;  %v247_v10 = vld [vmem:[%s1176_s1 + $0x30] sm:$0xff] (!%p140_p2)  ;;  %v248_v11 = vld [vmem:[%s1176_s1 + $0x38] sm:$0xff] (!%p140_p2)  ;;  %v249_v15 = vld [vmem:[%s1176_s1 + $0x40] sm:$0xff] (!%p140_p2)  ;;  %vm368_vm1 = vcmask (!%p140_p2), 1043456   ;;  %vm629_vm2 = vcmask (!%p140_p2), 326656  }
   0x8   : > { %767 = vmatpush1.bf16.msra.mxu0 (!%p140_p2), %v766_v4  ;;  %810 = vmatpush1.bf16.msra.mxu1 (!%p140_p2), %v766_v4  ;;  %v775_v14 = vpack.c.bf16 (!%p140_p2), %v248_v11, %v247_v10  ;;  %v250_v16 = vld [vmem:[%s1176_s1 + $0x48] sm:$0xff] (!%p140_p2)  ;;  %v251_v18 = vld [vmem:[%s1176_s1 + $0x50] sm:$0xff] (!%p140_p2)  ;;  %v252_v19 = vld [vmem:[%s1176_s1 + $0x58] sm:$0xff] (!%p140_p2) }
   0x9   : > { %768 = vmatprep.subr.bf16.mxu0 (!%p140_p2), %v840_v3  ;;  %799 = vmatprep.subr.bf16.mxu1 (!%p140_p2), %v840_v3  ;;  %v778_v17 = vpack.c.bf16 (!%p140_p2), %v250_v16, %v249_v15  ;;  %v781_v20 = vpack.c.bf16 (!%p140_p2), %v252_v19, %v251_v18  ;;  %v253_v21 = vld [vmem:[%s1176_s1 + $0x60] sm:$0xff] (!%p140_p2)  ;;  %v254_v22 = vld [vmem:[%s1176_s1 + $0x68] sm:$0xff] (!%p140_p2)  ;;  %v255_v24 = vld [vmem:[%s1176_s1 + $0x70] sm:$0xff] (!%p140_p2) }
   0xa   : > { %v784_v23 = vpack.c.bf16 (!%p140_p2), %v254_v22, %v253_v21  ;;  %v256_v25 = vld [vmem:[%s1176_s1 + $0x78] sm:$0xff] (!%p140_p2)  ;;  %v257_v27 = vld [vmem:[%s1176_s1 + $0x80] sm:$0xff] (!%p140_p2)  ;;  %v258_v28 = vld [vmem:[%s1176_s1 + $0x88] sm:$0xff] (!%p140_p2) }
   0xb   : > { %v787_v26 = vpack.c.bf16 (!%p140_p2), %v256_v25, %v255_v24  ;;  %v790_v29 = vpack.c.bf16 (!%p140_p2), %v258_v28, %v257_v27  ;;  %v259_v30 = vld [vmem:[%s1176_s1 + $0x90] sm:$0xff] (!%p140_p2)  ;;  %v260_v31 = vld [vmem:[%s1176_s1 + $0x98] sm:$0xff] (!%p140_p2)  ;;  %v261_v33 = vld [vmem:[%s1176_s1 + $0xa0] sm:$0xff] (!%p140_p2) }
   0xc   : > { %770 = vmatpush1.bf16.msra.mxu0 (!%p140_p2), %v769_v6  ;;  %811 = vmatpush1.bf16.msra.mxu1 (!%p140_p2), %v769_v6  ;;  %v793_v32 = vpack.c.bf16 (!%p140_p2), %v260_v31, %v259_v30  ;;  %v262_v34 = vld [vmem:[%s1176_s1 + $0xa8] sm:$0xff] (!%p140_p2)  ;;  %v263_v37 = vld [vmem:[%s1176_s1 + $0xb0] sm:$0xf] (!%p140_p2) }
   0xd   : > { %s1180_s22 = smov (!%p165_p3, %s723_s22), 63  ;;  %771 = vmatprep.subr.bf16.mxu0 %v840_v3  ;;  %800 = vmatprep.subr.bf16.mxu1 %v840_v3  ;;  %v796_v35 = vpack.c.bf16 %v262_v34, %v261_v33 }
   0xe   : > { %s764_s27 = sshll.u32 %s1180_s22, 4  ;;  %s727_s17 = sshll.u32 %s1180_s22, 3 }
   0xf   : > { %s901_s5 = scalar_lea.vmem %s1175_s0, %s764_s27 }
  0x10   : > { %v178_v12 = vld [vmem:[%s901_s5 + $0x8] sm:$0xff]  ;;  %773 = vmatpush1.bf16.msra.mxu0 %v772_v9  ;;  %812 = vmatpush1.bf16.msra.mxu1 %v772_v9  ;;  %v177_v38 = vld [vmem:[%s901_s5] sm:$0xff]  ;;  %v180_v40 = vld [vmem:[%s901_s5 + $0x18] sm:$0xff] }
  0x11   : > { %v210_v13 = vld [vmem:[%s901_s5 + $0x108] sm:$0xff]  ;;  %730 = vmatprep.mubr.msk.f32.mxu0 %vm271_vm0, %v178_v12  ;;  %774 = vmatprep.subr.bf16.mxu0 %v840_v3  ;;  %v209_v39 = vld [vmem:[%s901_s5 + $0x100] sm:$0xff]  ;;  %v212_v41 = vld [vmem:[%s901_s5 + $0x118] sm:$0xff] }
  0x12   : > { %746 = vmatprep.mubr.msk.f32.mxu1 %vm271_vm0, %v210_v13  ;;  %801 = vmatprep.subr.bf16.mxu1 %v840_v3  ;;  %v179_v42 = vld [vmem:[%s901_s5 + $0x10] sm:$0xff]  ;;  %v182_v44 = vld [vmem:[%s901_s5 + $0x28] sm:$0xff]  ;;  %v181_v46 = vld [vmem:[%s901_s5 + $0x20] sm:$0xff] }
  0x13   : > { %v211_v43 = vld [vmem:[%s901_s5 + $0x110] sm:$0xff]  ;;  %v214_v45 = vld [vmem:[%s901_s5 + $0x128] sm:$0xff]  ;;  %v213_v47 = vld [vmem:[%s901_s5 + $0x120] sm:$0xff] }
  0x14   : > { %776 = vmatpush1.bf16.msra.mxu0 %v775_v14  ;;  %813 = vmatpush1.bf16.msra.mxu1 %v775_v14  ;;  %v184_v48 = vld [vmem:[%s901_s5 + $0x38] sm:$0xff]  ;;  %v183_v50 = vld [vmem:[%s901_s5 + $0x30] sm:$0xff]  ;;  %v186_v52 = vld [vmem:[%s901_s5 + $0x48] sm:$0xff] }
  0x15   : > { %777 = vmatprep.subr.bf16.mxu0 %v840_v3  ;;  %802 = vmatprep.subr.bf16.mxu1 %v840_v3  ;;  %v216_v49 = vld [vmem:[%s901_s5 + $0x138] sm:$0xff]  ;;  %v215_v51 = vld [vmem:[%s901_s5 + $0x130] sm:$0xff]  ;;  %v218_v53 = vld [vmem:[%s901_s5 + $0x148] sm:$0xff] }
  0x16   : > { %v185_v54 = vld [vmem:[%s901_s5 + $0x40] sm:$0xff]  ;;  %v188_v56 = vld [vmem:[%s901_s5 + $0x58] sm:$0xff]  ;;  %v187_v58 = vld [vmem:[%s901_s5 + $0x50] sm:$0xff] }
  0x17   : > { %v217_v55 = vld [vmem:[%s901_s5 + $0x140] sm:$0xff]  ;;  %v220_v57 = vld [vmem:[%s901_s5 + $0x158] sm:$0xff]  ;;  %v219_v59 = vld [vmem:[%s901_s5 + $0x150] sm:$0xff] }
  0x18   : > { %779 = vmatpush1.bf16.msra.mxu0 %v778_v17  ;;  %814 = vmatpush1.bf16.msra.mxu1 %v778_v17  ;;  %v190_v60 = vld [vmem:[%s901_s5 + $0x68] sm:$0xff]  ;;  %v189_v62 = vld [vmem:[%s901_s5 + $0x60] sm:$0xff]  ;;  %v192_v0 = vld [vmem:[%s901_s5 + $0x78] sm:$0xff] }
  0x19   : > { %780 = vmatprep.subr.bf16.mxu0 %v840_v3  ;;  %803 = vmatprep.subr.bf16.mxu1 %v840_v3  ;;  %v222_v61 = vld [vmem:[%s901_s5 + $0x168] sm:$0xff]  ;;  %v221_v63 = vld [vmem:[%s901_s5 + $0x160] sm:$0xff]  ;;  %v224_v1 = vld [vmem:[%s901_s5 + $0x178] sm:$0xff] }
  0x1a   : > { %v191_v2 = vld [vmem:[%s901_s5 + $0x70] sm:$0xff]  ;;  %v194_v4 = vld [vmem:[%s901_s5 + $0x88] sm:$0xff]  ;;  %v193_v6 = vld [vmem:[%s901_s5 + $0x80] sm:$0xff] }
  0x1b   : > { %v226_v5 = vld [vmem:[%s901_s5 + $0x188] sm:$0xff]  ;;  %v225_v7 = vld [vmem:[%s901_s5 + $0x180] sm:$0xff]  ;;  %v196_v8 = vld [vmem:[%s901_s5 + $0x98] sm:$0xff] }
  0x1c   : > { %782 = vmatpush1.bf16.msra.mxu0 %v781_v20  ;;  %815 = vmatpush1.bf16.msra.mxu1 %v781_v20  ;;  %v228_v9 = vld [vmem:[%s901_s5 + $0x198] sm:$0xff]  ;;  %v195_v10 = vld [vmem:[%s901_s5 + $0x90] sm:$0xff]  ;;  %v198_v12 = vld [vmem:[%s901_s5 + $0xa8] sm:$0xff] }
  0x1d   : > { %783 = vmatprep.subr.bf16.mxu0 %v840_v3  ;;  %804 = vmatprep.subr.bf16.mxu1 %v840_v3  ;;  %v227_v11 = vld [vmem:[%s901_s5 + $0x190] sm:$0xff]  ;;  %v230_v13 = vld [vmem:[%s901_s5 + $0x1a8] sm:$0xff]  ;;  %v197_v14 = vld [vmem:[%s901_s5 + $0xa0] sm:$0xff] }
  0x1e   : > { %v229_v15 = vld [vmem:[%s901_s5 + $0x1a0] sm:$0xff]  ;;  %v200_v16 = vld [vmem:[%s901_s5 + $0xb8] sm:$0xff]  ;;  %v199_v18 = vld [vmem:[%s901_s5 + $0xb0] sm:$0xff] }
  0x1f   : > { %v232_v17 = vld [vmem:[%s901_s5 + $0x1b8] sm:$0xff]  ;;  %v231_v19 = vld [vmem:[%s901_s5 + $0x1b0] sm:$0xff]  ;;  %v202_v20 = vld [vmem:[%s901_s5 + $0xc8] sm:$0xff] }
  0x20   : > { %785 = vmatpush1.bf16.msra.mxu0 %v784_v23  ;;  %816 = vmatpush1.bf16.msra.mxu1 %v784_v23  ;;  %v234_v21 = vld [vmem:[%s901_s5 + $0x1c8] sm:$0xff]  ;;  %v201_v22 = vld [vmem:[%s901_s5 + $0xc0] sm:$0xff]  ;;  %v204_v24 = vld [vmem:[%s901_s5 + $0xd8] sm:$0xff] }
  0x21   : > { %786 = vmatprep.subr.bf16.mxu0 %v840_v3  ;;  %805 = vmatprep.subr.bf16.mxu1 %v840_v3  ;;  %v233_v23 = vld [vmem:[%s901_s5 + $0x1c0] sm:$0xff]  ;;  %v236_v25 = vld [vmem:[%s901_s5 + $0x1d8] sm:$0xff]  ;;  %v235_v27 = vld [vmem:[%s901_s5 + $0x1d0] sm:$0xff] }
  0x22   : > { %v206_v28 = vld [vmem:[%s901_s5 + $0xe8] sm:$0xff]  ;;  %v205_v30 = vld [vmem:[%s901_s5 + $0xe0] sm:$0xff]  ;;  %v240_v33 = vld [vmem:[%s901_s5 + $0x1f8] sm:$0xff] }
  0x23   : > { %v237_v31 = vld [vmem:[%s901_s5 + $0x1e0] sm:$0xff]  ;;  %v207_v34 = vld [vmem:[%s901_s5 + $0xf0] sm:$0xff] }
  0x24   : > { %788 = vmatpush1.bf16.msra.mxu0 %v787_v26  ;;  %817 = vmatpush1.bf16.msra.mxu1 %v787_v26  ;;  %v203_v26 = vld [vmem:[%s901_s5 + $0xd0] sm:$0xff] }
  0x25   : > { %789 = vmatprep.subr.bf16.mxu0 %v840_v3  ;;  %806 = vmatprep.subr.bf16.mxu1 %v840_v3 }
  0x28   : > { %791 = vmatpush1.bf16.msra.mxu0 %v790_v29  ;;  %818 = vmatpush1.bf16.msra.mxu1 %v790_v29  ;;  %v238_v29 = vld [vmem:[%s901_s5 + $0x1e8] sm:$0xff] }
  0x29   : > { %792 = vmatprep.subr.bf16.mxu0 %v840_v3  ;;  %807 = vmatprep.subr.bf16.mxu1 %v840_v3 }
  0x2c   : > { %794 = vmatpush1.bf16.msra.mxu0 %v793_v32  ;;  %819 = vmatpush1.bf16.msra.mxu1 %v793_v32  ;;  %v208_v32 = vld [vmem:[%s901_s5 + $0xf8] sm:$0xff] }
  0x2d   : > { %795 = vmatprep.subr.bf16.mxu0 %v840_v3  ;;  %808 = vmatprep.subr.bf16.mxu1 %v840_v3  ;;  %v223_v3 = vld [vmem:[%s901_s5 + $0x170] sm:$0xff] }
  0x30   : > { %797 = vmatpush1.bf16.msra.mxu0 %v796_v35  ;;  %820 = vmatpush1.bf16.msra.mxu1 %v796_v35  ;;  %v239_v35 = vld [vmem:[%s901_s5 + $0x1f0] sm:$0xff]  ;;  %s1076_s5 = scalar_lea.vmem %s1178_s3, %s727_s17 }
  0x31   : > { %416 = vmatprep.subr.mxu0 %v841_v36  ;;  %809 = vmatprep.subr.mxu1 %v841_v36  ;;  %v1068_v36 = vld [vmem:[%s1177_s2] ss:$0 sm:$0xff] }
  0x34   : > { %729 = vmatpush1.msk.msra.mxu0 %vm368_vm1, %v263_v37  ;;  %821 = vmatpush1.msk.msra.mxu1 %vm368_vm1, %v263_v37 }
  0x35   : > { %437 = vmatmul.mubr.f32.vlgmr.msra.gmra.mrb[0].mxu0 %v177_v38  ;;  %517 = vmatmul.mubr.f32.vlgmr.msra.gmra.mrb[0].mxu1 %v209_v39 }
  0x36   : > { %731 = vmatprep.mubr.msk.f32.mxu0 %vm271_vm0, %v180_v40  ;;  %747 = vmatprep.mubr.msk.f32.mxu1 %vm271_vm0, %v212_v41 }
  0x39   : > { %442 = vmatmul.mubr.f32.gmra.mrb[2].mxu0 %v179_v42  ;;  %522 = vmatmul.mubr.f32.gmra.mrb[2].mxu1 %v211_v43 }
  0x3a   : > { %732 = vmatprep.mubr.msk.f32.mxu0 %vm271_vm0, %v182_v44  ;;  %748 = vmatprep.mubr.msk.f32.mxu1 %vm271_vm0, %v214_v45 }
  0x3d   : > { %447 = vmatmul.mubr.f32.gmra.mrb[4].mxu0 %v181_v46  ;;  %527 = vmatmul.mubr.f32.gmra.mrb[4].mxu1 %v213_v47 }
  0x3e   : > { %733 = vmatprep.mubr.msk.f32.mxu0 %vm271_vm0, %v184_v48  ;;  %749 = vmatprep.mubr.msk.f32.mxu1 %vm271_vm0, %v216_v49 }
  0x41   : > { %452 = vmatmul.mubr.f32.gmra.mrb[6].mxu0 %v183_v50  ;;  %532 = vmatmul.mubr.f32.gmra.mrb[6].mxu1 %v215_v51 }
  0x42   : > { %734 = vmatprep.mubr.msk.f32.mxu0 %vm271_vm0, %v186_v52  ;;  %750 = vmatprep.mubr.msk.f32.mxu1 %vm271_vm0, %v218_v53 }
  0x45   : > { %457 = vmatmul.mubr.f32.gmra.mrb[8].mxu0 %v185_v54  ;;  %537 = vmatmul.mubr.f32.gmra.mrb[8].mxu1 %v217_v55 }
  0x46   : > { %735 = vmatprep.mubr.msk.f32.mxu0 %vm271_vm0, %v188_v56  ;;  %751 = vmatprep.mubr.msk.f32.mxu1 %vm271_vm0, %v220_v57 }
  0x49   : > { %462 = vmatmul.mubr.f32.gmra.mrb[10].mxu0 %v187_v58  ;;  %542 = vmatmul.mubr.f32.gmra.mrb[10].mxu1 %v219_v59 }
  0x4a   : > { %736 = vmatprep.mubr.msk.f32.mxu0 %vm271_vm0, %v190_v60  ;;  %752 = vmatprep.mubr.msk.f32.mxu1 %vm271_vm0, %v222_v61 }
  0x4d   : > { %467 = vmatmul.mubr.f32.gmra.mrb[12].mxu0 %v189_v62  ;;  %547 = vmatmul.mubr.f32.gmra.mrb[12].mxu1 %v221_v63 }
  0x4e   : > { %737 = vmatprep.mubr.msk.f32.mxu0 %vm271_vm0, %v192_v0  ;;  %753 = vmatprep.mubr.msk.f32.mxu1 %vm271_vm0, %v224_v1 }
  0x51   : > { %472 = vmatmul.mubr.f32.gmra.mrb[14].mxu0 %v191_v2  ;;  %552 = vmatmul.mubr.f32.gmra.mrb[14].mxu1 %v223_v3 }
  0x52   : > { %738 = vmatprep.mubr.msk.f32.mxu0 %vm271_vm0, %v194_v4  ;;  %754 = vmatprep.mubr.msk.f32.mxu1 %vm271_vm0, %v226_v5 }
  0x55   : > { %477 = vmatmul.mubr.f32.gmra.mrb[16].mxu0 %v193_v6  ;;  %557 = vmatmul.mubr.f32.gmra.mrb[16].mxu1 %v225_v7 }
  0x56   : > { %739 = vmatprep.mubr.msk.f32.mxu0 %vm271_vm0, %v196_v8  ;;  %755 = vmatprep.mubr.msk.f32.mxu1 %vm271_vm0, %v228_v9 }
  0x59   : > { %482 = vmatmul.mubr.f32.gmra.mrb[18].mxu0 %v195_v10  ;;  %562 = vmatmul.mubr.f32.gmra.mrb[18].mxu1 %v227_v11 }
  0x5a   : > { %740 = vmatprep.mubr.msk.f32.mxu0 %vm271_vm0, %v198_v12  ;;  %756 = vmatprep.mubr.msk.f32.mxu1 %vm271_vm0, %v230_v13 }
  0x5d   : > { %487 = vmatmul.mubr.f32.gmra.mrb[20].mxu0 %v197_v14  ;;  %567 = vmatmul.mubr.f32.gmra.mrb[20].mxu1 %v229_v15 }
  0x5e   : > { %741 = vmatprep.mubr.msk.f32.mxu0 %vm271_vm0, %v200_v16  ;;  %757 = vmatprep.mubr.msk.f32.mxu1 %vm271_vm0, %v232_v17 }
  0x61   : > { %492 = vmatmul.mubr.f32.gmra.mrb[22].mxu0 %v199_v18  ;;  %572 = vmatmul.mubr.f32.gmra.mrb[22].mxu1 %v231_v19 }
  0x62   : > { %742 = vmatprep.mubr.msk.f32.mxu0 %vm271_vm0, %v202_v20  ;;  %758 = vmatprep.mubr.msk.f32.mxu1 %vm271_vm0, %v234_v21 }
  0x65   : > { %497 = vmatmul.mubr.f32.gmra.mrb[24].mxu0 %v201_v22  ;;  %577 = vmatmul.mubr.f32.gmra.mrb[24].mxu1 %v233_v23 }
  0x66   : > { %743 = vmatprep.mubr.msk.f32.mxu0 %vm271_vm0, %v204_v24  ;;  %759 = vmatprep.mubr.msk.f32.mxu1 %vm271_vm0, %v236_v25 }
  0x69   : > { %502 = vmatmul.mubr.f32.gmra.mrb[26].mxu0 %v203_v26  ;;  %582 = vmatmul.mubr.f32.gmra.mrb[26].mxu1 %v235_v27 }
  0x6a   : > { %744 = vmatprep.mubr.msk.f32.mxu0 %vm271_vm0, %v206_v28  ;;  %760 = vmatprep.mubr.msk.f32.mxu1 %vm271_vm0, %v238_v29 }
  0x6d   : > { %507 = vmatmul.mubr.f32.gmra.mrb[28].mxu0 %v205_v30  ;;  %587 = vmatmul.mubr.f32.gmra.mrb[28].mxu1 %v237_v31 }
  0x6e   : > { %745 = vmatprep.mubr.msk.f32.mxu0 %vm271_vm0, %v208_v32  ;;  %761 = vmatprep.mubr.msk.f32.mxu1 %vm271_vm0, %v240_v33 }
  0x71   : > { %512 = vmatmul.mubr.f32.gmra.mrb[30].mxu0 %v207_v34  ;;  %592 = vmatmul.mubr.f32.gmra.mrb[30].mxu1 %v239_v35 }
 0x108   : > { %v438_v37 = vpop.f32.mrb[0].mxu0  ;;  %v518_v38 = vpop.f32.mrb[0].mxu1 }
 0x109   : > { %v439_v39 = vadd.f32 %v1068_v36, %v438_v37  ;;  %v519_v40 = vadd.f32 %v1068_v36, %v518_v38  ;;  %v440_v41 = vpop.f32.mrb[1].mxu0  ;;  %v520_v42 = vpop.f32.mrb[1].mxu1 }
 0x10b   : > { %v597_v43 = vmax.f32 %v439_v39, 0.0  ;;  %v613_v44 = vmax.f32 %v519_v40, 0.0 }
 0x10c   : > { %v443_v45 = vpop.f32.mrb[2].mxu0  ;;  %v523_v46 = vpop.f32.mrb[2].mxu1 }
 0x10d   : > { %630 = vst.msk [vmem:[%s1076_s5] sm:$0xff] %vm629_vm2, %v597_v43  ;;  %646 = vst.msk [vmem:[%s1076_s5 + $0x80] sm:$0xff] %vm629_vm2, %v613_v44  ;;  %v444_v47 = vadd.f32 %v1068_v36, %v443_v45  ;;  %v524_v48 = vadd.f32 %v1068_v36, %v523_v46  ;;  %v445_v49 = vpop.f32.mrb[3].mxu0  ;;  %v525_v50 = vpop.f32.mrb[3].mxu1 }
 0x10f   : > { %v598_v51 = vmax.f32 %v444_v47, 0.0  ;;  %v614_v52 = vmax.f32 %v524_v48, 0.0 }
 0x110   : > { %v448_v53 = vpop.f32.mrb[4].mxu0  ;;  %v528_v54 = vpop.f32.mrb[4].mxu1 }
 0x111   : > { %631 = vst.msk [vmem:[%s1076_s5 + $0x8] sm:$0xff] %vm629_vm2, %v598_v51  ;;  %647 = vst.msk [vmem:[%s1076_s5 + $0x88] sm:$0xff] %vm629_vm2, %v614_v52  ;;  %v449_v55 = vadd.f32 %v1068_v36, %v448_v53  ;;  %v529_v56 = vadd.f32 %v1068_v36, %v528_v54  ;;  %v450_v57 = vpop.f32.mrb[5].mxu0  ;;  %v530_v58 = vpop.f32.mrb[5].mxu1 }
 0x113   : > { %v599_v59 = vmax.f32 %v449_v55, 0.0  ;;  %v615_v60 = vmax.f32 %v529_v56, 0.0 }
 0x114   : > { %v453_v61 = vpop.f32.mrb[6].mxu0  ;;  %v533_v62 = vpop.f32.mrb[6].mxu1 }
 0x115   : > { %632 = vst.msk [vmem:[%s1076_s5 + $0x10] sm:$0xff] %vm629_vm2, %v599_v59  ;;  %648 = vst.msk [vmem:[%s1076_s5 + $0x90] sm:$0xff] %vm629_vm2, %v615_v60  ;;  %v454_v63 = vadd.f32 %v1068_v36, %v453_v61  ;;  %v534_v0 = vadd.f32 %v1068_v36, %v533_v62  ;;  %v455_v1 = vpop.f32.mrb[7].mxu0  ;;  %v535_v2 = vpop.f32.mrb[7].mxu1 }
 0x117   : > { %v600_v3 = vmax.f32 %v454_v63, 0.0  ;;  %v616_v4 = vmax.f32 %v534_v0, 0.0 }
 0x118   : > { %v458_v5 = vpop.f32.mrb[8].mxu0  ;;  %v538_v6 = vpop.f32.mrb[8].mxu1 }
 0x119   : > { %633 = vst.msk [vmem:[%s1076_s5 + $0x18] sm:$0xff] %vm629_vm2, %v600_v3  ;;  %649 = vst.msk [vmem:[%s1076_s5 + $0x98] sm:$0xff] %vm629_vm2, %v616_v4  ;;  %v459_v7 = vadd.f32 %v1068_v36, %v458_v5  ;;  %v539_v8 = vadd.f32 %v1068_v36, %v538_v6  ;;  %v460_v9 = vpop.f32.mrb[9].mxu0  ;;  %v540_v10 = vpop.f32.mrb[9].mxu1 }
 0x11b   : > { %v601_v11 = vmax.f32 %v459_v7, 0.0  ;;  %v617_v12 = vmax.f32 %v539_v8, 0.0 }
 0x11c   : > { %v463_v13 = vpop.f32.mrb[10].mxu0  ;;  %v543_v14 = vpop.f32.mrb[10].mxu1 }
 0x11d   : > { %634 = vst.msk [vmem:[%s1076_s5 + $0x20] sm:$0xff] %vm629_vm2, %v601_v11  ;;  %650 = vst.msk [vmem:[%s1076_s5 + $0xa0] sm:$0xff] %vm629_vm2, %v617_v12  ;;  %v464_v15 = vadd.f32 %v1068_v36, %v463_v13  ;;  %v544_v16 = vadd.f32 %v1068_v36, %v543_v14  ;;  %v465_v17 = vpop.f32.mrb[11].mxu0  ;;  %v545_v18 = vpop.f32.mrb[11].mxu1 }
 0x11f   : > { %v602_v19 = vmax.f32 %v464_v15, 0.0  ;;  %v618_v20 = vmax.f32 %v544_v16, 0.0 }
 0x120   : > { %v468_v21 = vpop.f32.mrb[12].mxu0  ;;  %v548_v22 = vpop.f32.mrb[12].mxu1 }
 0x121   : > { %635 = vst.msk [vmem:[%s1076_s5 + $0x28] sm:$0xff] %vm629_vm2, %v602_v19  ;;  %651 = vst.msk [vmem:[%s1076_s5 + $0xa8] sm:$0xff] %vm629_vm2, %v618_v20  ;;  %v469_v23 = vadd.f32 %v1068_v36, %v468_v21  ;;  %v549_v24 = vadd.f32 %v1068_v36, %v548_v22  ;;  %v470_v25 = vpop.f32.mrb[13].mxu0  ;;  %v550_v26 = vpop.f32.mrb[13].mxu1 }
 0x123   : > { %v603_v27 = vmax.f32 %v469_v23, 0.0  ;;  %v619_v28 = vmax.f32 %v549_v24, 0.0 }
 0x124   : > { %v473_v29 = vpop.f32.mrb[14].mxu0  ;;  %v553_v30 = vpop.f32.mrb[14].mxu1 }
 0x125   : > { %636 = vst.msk [vmem:[%s1076_s5 + $0x30] sm:$0xff] %vm629_vm2, %v603_v27  ;;  %652 = vst.msk [vmem:[%s1076_s5 + $0xb0] sm:$0xff] %vm629_vm2, %v619_v28  ;;  %v474_v31 = vadd.f32 %v1068_v36, %v473_v29  ;;  %v554_v32 = vadd.f32 %v1068_v36, %v553_v30  ;;  %v475_v33 = vpop.f32.mrb[15].mxu0  ;;  %v555_v34 = vpop.f32.mrb[15].mxu1 }
 0x127   : > { %v604_v35 = vmax.f32 %v474_v31, 0.0  ;;  %v620_v37 = vmax.f32 %v554_v32, 0.0 }
 0x128   : > { %v478_v38 = vpop.f32.mrb[16].mxu0  ;;  %v558_v39 = vpop.f32.mrb[16].mxu1 }
 0x129   : > { %637 = vst.msk [vmem:[%s1076_s5 + $0x38] sm:$0xff] %vm629_vm2, %v604_v35  ;;  %653 = vst.msk [vmem:[%s1076_s5 + $0xb8] sm:$0xff] %vm629_vm2, %v620_v37  ;;  %v479_v40 = vadd.f32 %v1068_v36, %v478_v38  ;;  %v559_v41 = vadd.f32 %v1068_v36, %v558_v39  ;;  %v480_v42 = vpop.f32.mrb[17].mxu0  ;;  %v560_v43 = vpop.f32.mrb[17].mxu1 }
 0x12b   : > { %v605_v44 = vmax.f32 %v479_v40, 0.0  ;;  %v621_v45 = vmax.f32 %v559_v41, 0.0 }
 0x12c   : > { %v483_v46 = vpop.f32.mrb[18].mxu0  ;;  %v563_v47 = vpop.f32.mrb[18].mxu1 }
 0x12d   : > { %638 = vst.msk [vmem:[%s1076_s5 + $0x40] sm:$0xff] %vm629_vm2, %v605_v44  ;;  %654 = vst.msk [vmem:[%s1076_s5 + $0xc0] sm:$0xff] %vm629_vm2, %v621_v45  ;;  %v484_v48 = vadd.f32 %v1068_v36, %v483_v46  ;;  %v564_v49 = vadd.f32 %v1068_v36, %v563_v47  ;;  %v485_v50 = vpop.f32.mrb[19].mxu0  ;;  %v565_v51 = vpop.f32.mrb[19].mxu1 }
 0x12f   : > { %v606_v52 = vmax.f32 %v484_v48, 0.0  ;;  %v622_v53 = vmax.f32 %v564_v49, 0.0 }
 0x130   : > { %v488_v54 = vpop.f32.mrb[20].mxu0  ;;  %v568_v55 = vpop.f32.mrb[20].mxu1 }
 0x131   : > { %639 = vst.msk [vmem:[%s1076_s5 + $0x48] sm:$0xff] %vm629_vm2, %v606_v52  ;;  %655 = vst.msk [vmem:[%s1076_s5 + $0xc8] sm:$0xff] %vm629_vm2, %v622_v53  ;;  %v489_v56 = vadd.f32 %v1068_v36, %v488_v54  ;;  %v569_v57 = vadd.f32 %v1068_v36, %v568_v55  ;;  %v490_v58 = vpop.f32.mrb[21].mxu0  ;;  %v570_v59 = vpop.f32.mrb[21].mxu1 }
 0x133   : > { %v607_v60 = vmax.f32 %v489_v56, 0.0  ;;  %v623_v61 = vmax.f32 %v569_v57, 0.0 }
 0x134   : > { %v493_v62 = vpop.f32.mrb[22].mxu0  ;;  %v573_v63 = vpop.f32.mrb[22].mxu1 }
 0x135   : > { %640 = vst.msk [vmem:[%s1076_s5 + $0x50] sm:$0xff] %vm629_vm2, %v607_v60  ;;  %656 = vst.msk [vmem:[%s1076_s5 + $0xd0] sm:$0xff] %vm629_vm2, %v623_v61  ;;  %v494_v0 = vadd.f32 %v1068_v36, %v493_v62  ;;  %v574_v1 = vadd.f32 %v1068_v36, %v573_v63  ;;  %v495_v2 = vpop.f32.mrb[23].mxu0  ;;  %v575_v3 = vpop.f32.mrb[23].mxu1 }
 0x137   : > { %v608_v4 = vmax.f32 %v494_v0, 0.0  ;;  %v624_v5 = vmax.f32 %v574_v1, 0.0 }
 0x138   : > { %v498_v6 = vpop.f32.mrb[24].mxu0  ;;  %v578_v7 = vpop.f32.mrb[24].mxu1 }
 0x139   : > { %641 = vst.msk [vmem:[%s1076_s5 + $0x58] sm:$0xff] %vm629_vm2, %v608_v4  ;;  %657 = vst.msk [vmem:[%s1076_s5 + $0xd8] sm:$0xff] %vm629_vm2, %v624_v5  ;;  %v499_v8 = vadd.f32 %v1068_v36, %v498_v6  ;;  %v579_v9 = vadd.f32 %v1068_v36, %v578_v7  ;;  %v500_v10 = vpop.f32.mrb[25].mxu0  ;;  %v580_v11 = vpop.f32.mrb[25].mxu1 }
 0x13b   : > { %v609_v12 = vmax.f32 %v499_v8, 0.0  ;;  %v625_v13 = vmax.f32 %v579_v9, 0.0 }
 0x13c   : > { %v503_v14 = vpop.f32.mrb[26].mxu0  ;;  %v583_v15 = vpop.f32.mrb[26].mxu1 }
 0x13d   : > { %642 = vst.msk [vmem:[%s1076_s5 + $0x60] sm:$0xff] %vm629_vm2, %v609_v12  ;;  %658 = vst.msk [vmem:[%s1076_s5 + $0xe0] sm:$0xff] %vm629_vm2, %v625_v13  ;;  %v504_v16 = vadd.f32 %v1068_v36, %v503_v14  ;;  %v584_v17 = vadd.f32 %v1068_v36, %v583_v15  ;;  %v505_v18 = vpop.f32.mrb[27].mxu0  ;;  %v585_v19 = vpop.f32.mrb[27].mxu1 }
 0x13f   : > { %v610_v20 = vmax.f32 %v504_v16, 0.0  ;;  %v626_v21 = vmax.f32 %v584_v17, 0.0 }
 0x140   : > { %v508_v22 = vpop.f32.mrb[28].mxu0  ;;  %v588_v23 = vpop.f32.mrb[28].mxu1 }
 0x141   : > { %643 = vst.msk [vmem:[%s1076_s5 + $0x68] sm:$0xff] %vm629_vm2, %v610_v20  ;;  %659 = vst.msk [vmem:[%s1076_s5 + $0xe8] sm:$0xff] %vm629_vm2, %v626_v21  ;;  %v509_v24 = vadd.f32 %v1068_v36, %v508_v22  ;;  %v589_v25 = vadd.f32 %v1068_v36, %v588_v23  ;;  %v510_v26 = vpop.f32.mrb[29].mxu0  ;;  %v590_v27 = vpop.f32.mrb[29].mxu1 }
 0x143   : > { %v611_v28 = vmax.f32 %v509_v24, 0.0  ;;  %v627_v29 = vmax.f32 %v589_v25, 0.0 }
 0x144   : > { %v513_v30 = vpop.f32.mrb[30].mxu0  ;;  %v593_v31 = vpop.f32.mrb[30].mxu1 }
 0x145   : > { %644 = vst.msk [vmem:[%s1076_s5 + $0x70] sm:$0xff] %vm629_vm2, %v611_v28  ;;  %660 = vst.msk [vmem:[%s1076_s5 + $0xf0] sm:$0xff] %vm629_vm2, %v627_v29  ;;  %v514_v32 = vadd.f32 %v1068_v36, %v513_v30  ;;  %v594_v33 = vadd.f32 %v1068_v36, %v593_v31  ;;  %v515_v34 = vpop.f32.mrb[31].mxu0  ;;  %v595_v35 = vpop.f32.mrb[31].mxu1 }
 0x147   : > { %v612_v37 = vmax.f32 %v514_v32, 0.0  ;;  %v628_v38 = vmax.f32 %v594_v33, 0.0 }
 0x149   : > { %645 = vst.msk [vmem:[%s1076_s5 + $0x78] sm:$0xff] %vm629_vm2, %v612_v37  ;;  %661 = vst.msk [vmem:[%s1076_s5 + $0xf8] sm:$0xff] %vm629_vm2, %v628_v38 }
 0x14a PF: > { %s13_s12 = sadd.s32 1, %s838_s12  }
 0x14b   : > { %p10_p4 = scmp.ge.s32.totalorder %s13_s12, 4  }
 0x14d   :  { %12 = sbr.rel (!%p10_p4) target bundleno = 1 (0x1), region = 62 }

// kernel: model_forward.13
= control target key start
LH: loop header
LB: loop body
LE: loop exit
PB: predicated region body
PF: predicated region fallthrough
CT: control target
= control target key end

     0   :  { %s594_s12 = smov 0   ;;  %s797_s0 = inlined_call_operand.vmem [shape: f32[176,240], index: 0, kind: input, shape index: {}]   ;;  %s798_s1 = inlined_call_operand.vmem [shape: f32[240,80], index: 1, kind: input, shape index: {}]   ;;  %s799_s2 = inlined_call_operand.vmem [shape: f32[1,80], index: 2, kind: input, shape index: {}]   ;;  %s800_s3 = inlined_call_operand.vmem [shape: f32[176,80], index: 3, kind: output, shape index: {}]  }
   0x1 LB: > { %s458_s13 = sadd.s32 4294967295, %s571_s12   ;;  %p462_p0 = scmp.ge.s32.totalorder %s571_s12, 1  ;;  %s571_s12 = sphi %s594_s12, %s13_s12  }
   0x2   : > { %p139_p1 = scmp.lt.s32.totalorder %s571_s12, 3 }
   0x4   : > { %p140_p2 = pnand %p462_p0, %p139_p1 }
   0x5   : > { %v199_v0 = vld [vmem:[%s798_s1] sm:$0xff] (!%p140_p2)  ;;  %v200_v1 = vld [vmem:[%s798_s1 + $0x8] sm:$0xff] (!%p140_p2)  ;;  %v201_v2 = vld [vmem:[%s798_s1 + $0x10] sm:$0xff] (!%p140_p2)  ;;  %s164_s20 = smul.u32 (!%p140_p2), 11, %s458_s13  ;;  %v573_v3 = vmov (!%p140_p2), 0.0|0.0   ;;  %vm236_vm0 = vcmask (!%p140_p2), 916480  }
   0x6   : > { %143 = sbr.rel (%p140_p2) target bundleno = 302 (0x12e), region = 32  ;;  %481 = vmatprep.subr.bf16.mxu0 (!%p140_p2), %v573_v3  ;;  %v482_v4 = vpack.c.bf16 (!%p140_p2), %v200_v1, %v199_v0  ;;  %526 = vmatprep.subr.bf16.mxu1 (!%p140_p2), %v573_v3  ;;  %v202_v5 = vld [vmem:[%s798_s1 + $0x18] sm:$0xff] (!%p140_p2)  ;;  %v203_v7 = vld [vmem:[%s798_s1 + $0x20] sm:$0xff] (!%p140_p2)  ;;  %v204_v8 = vld [vmem:[%s798_s1 + $0x28] sm:$0xff] (!%p140_p2)  ;;  %vm390_vm1 = vcmask (!%p140_p2), 654336  }
   0x7   : > { %p165_p3 = scmp.lt.s32.totalorder (!%p140_p2), %s164_s20, 21  ;;  %v485_v6 = vpack.c.bf16 (!%p140_p2), %v202_v5, %v201_v2  ;;  %v488_v9 = vpack.c.bf16 (!%p140_p2), %v204_v8, %v203_v7  ;;  %v205_v10 = vld [vmem:[%s798_s1 + $0x30] sm:$0xff] (!%p140_p2)  ;;  %v206_v11 = vld [vmem:[%s798_s1 + $0x38] sm:$0xff] (!%p140_p2)  ;;  %v207_v15 = vld [vmem:[%s798_s1 + $0x40] sm:$0xff] (!%p140_p2) }
   0x8   : > { %483 = vmatpush1.bf16.msra.mxu0 (!%p140_p2), %v482_v4  ;;  %541 = vmatpush1.bf16.msra.mxu1 (!%p140_p2), %v482_v4  ;;  %v491_v14 = vpack.c.bf16 (!%p140_p2), %v206_v11, %v205_v10  ;;  %v208_v16 = vld [vmem:[%s798_s1 + $0x48] sm:$0xff] (!%p140_p2)  ;;  %v209_v18 = vld [vmem:[%s798_s1 + $0x50] sm:$0xff] (!%p140_p2)  ;;  %v210_v19 = vld [vmem:[%s798_s1 + $0x58] sm:$0xff] (!%p140_p2) }
   0x9   : > { %484 = vmatprep.subr.bf16.mxu0 (!%p140_p2), %v573_v3  ;;  %527 = vmatprep.subr.bf16.mxu1 (!%p140_p2), %v573_v3  ;;  %v494_v17 = vpack.c.bf16 (!%p140_p2), %v208_v16, %v207_v15  ;;  %v497_v20 = vpack.c.bf16 (!%p140_p2), %v210_v19, %v209_v18  ;;  %v211_v21 = vld [vmem:[%s798_s1 + $0x60] sm:$0xff] (!%p140_p2)  ;;  %v212_v22 = vld [vmem:[%s798_s1 + $0x68] sm:$0xff] (!%p140_p2)  ;;  %v213_v24 = vld [vmem:[%s798_s1 + $0x70] sm:$0xff] (!%p140_p2) }
   0xa   : > { %v500_v23 = vpack.c.bf16 (!%p140_p2), %v212_v22, %v211_v21  ;;  %v214_v25 = vld [vmem:[%s798_s1 + $0x78] sm:$0xff] (!%p140_p2)  ;;  %v215_v27 = vld [vmem:[%s798_s1 + $0x80] sm:$0xff] (!%p140_p2)  ;;  %v216_v28 = vld [vmem:[%s798_s1 + $0x88] sm:$0xff] (!%p140_p2) }
   0xb   : > { %v503_v26 = vpack.c.bf16 (!%p140_p2), %v214_v25, %v213_v24  ;;  %v506_v29 = vpack.c.bf16 (!%p140_p2), %v216_v28, %v215_v27  ;;  %v217_v30 = vld [vmem:[%s798_s1 + $0x90] sm:$0xff] (!%p140_p2)  ;;  %v218_v31 = vld [vmem:[%s798_s1 + $0x98] sm:$0xff] (!%p140_p2)  ;;  %v219_v33 = vld [vmem:[%s798_s1 + $0xa0] sm:$0xff] (!%p140_p2) }
   0xc   : > { %486 = vmatpush1.bf16.msra.mxu0 (!%p140_p2), %v485_v6  ;;  %542 = vmatpush1.bf16.msra.mxu1 (!%p140_p2), %v485_v6  ;;  %v509_v32 = vpack.c.bf16 (!%p140_p2), %v218_v31, %v217_v30  ;;  %v220_v34 = vld [vmem:[%s798_s1 + $0xa8] sm:$0xff] (!%p140_p2)  ;;  %v221_v36 = vld [vmem:[%s798_s1 + $0xb0] sm:$0xff] (!%p140_p2)  ;;  %v222_v37 = vld [vmem:[%s798_s1 + $0xb8] sm:$0xff] (!%p140_p2) }
   0xd   : > { %s802_s20 = smov (!%p165_p3, %s164_s20), 21  ;;  %487 = vmatprep.subr.bf16.mxu0 %v573_v3  ;;  %528 = vmatprep.subr.bf16.mxu1 %v573_v3  ;;  %v512_v35 = vpack.c.bf16 %v220_v34, %v219_v33  ;;  %v515_v38 = vpack.c.bf16 %v222_v37, %v221_v36  ;;  %v223_v39 = vld [vmem:[%s798_s1 + $0xc0] sm:$0xff]  ;;  %v224_v40 = vld [vmem:[%s798_s1 + $0xc8] sm:$0xff]  ;;  %v225_v42 = vld [vmem:[%s798_s1 + $0xd0] sm:$0xff] }
   0xe   : > { %s480_s27 = sshll.u32 %s802_s20, 4  ;;  %v518_v41 = vpack.c.bf16 %v224_v40, %v223_v39  ;;  %v226_v43 = vld [vmem:[%s798_s1 + $0xd8] sm:$0xff]  ;;  %v227_v45 = vld [vmem:[%s798_s1 + $0xe0] sm:$0xff]  ;;  %v228_v46 = vld [vmem:[%s798_s1 + $0xe8] sm:$0xff]  ;;  %s465_s4 = sshll.u32 %s802_s20, 3 }
   0xf   : > { %s630_s30 = scalar_lea.vmem %s797_s0, %s480_s27  ;;  %v521_v44 = vpack.c.bf16 %v226_v43, %v225_v42  ;;  %v524_v47 = vpack.c.bf16 %v228_v46, %v227_v45  ;;  %v466_v4 = vld [vmem:[%s799_s2] ss:$0 sm:$0xff]  ;;  %s770_s9 = scalar_lea.vmem %s800_s3, %s465_s4 }
  0x10   : > { %v178_v12 = vld [vmem:[%s630_s30 + $0x8] sm:$0xff]  ;;  %489 = vmatpush1.bf16.msra.mxu0 %v488_v9  ;;  %543 = vmatpush1.bf16.msra.mxu1 %v488_v9  ;;  %v177_v48 = vld [vmem:[%s630_s30] sm:$0xff]  ;;  %v180_v50 = vld [vmem:[%s630_s30 + $0x18] sm:$0xff] }
  0x11   : > { %v190_v13 = vld [vmem:[%s630_s30 + $0x68] sm:$0xff]  ;;  %490 = vmatprep.subr.bf16.mxu0 %v573_v3  ;;  %529 = vmatprep.subr.bf16.mxu1 %v573_v3  ;;  %v189_v49 = vld [vmem:[%s630_s30 + $0x60] sm:$0xff]  ;;  %v192_v51 = vld [vmem:[%s630_s30 + $0x78] sm:$0xff] }
  0x12   : > { %467 = vmatprep.mubr.msk.f32.mxu0 %vm236_vm0, %v178_v12  ;;  %473 = vmatprep.mubr.msk.f32.mxu1 %vm236_vm0, %v190_v13  ;;  %v179_v52 = vld [vmem:[%s630_s30 + $0x10] sm:$0xff]  ;;  %v182_v54 = vld [vmem:[%s630_s30 + $0x28] sm:$0xff]  ;;  %v181_v56 = vld [vmem:[%s630_s30 + $0x20] sm:$0xff] }
  0x13   : > { %v191_v53 = vld [vmem:[%s630_s30 + $0x70] sm:$0xff]  ;;  %v194_v55 = vld [vmem:[%s630_s30 + $0x88] sm:$0xff]  ;;  %v193_v57 = vld [vmem:[%s630_s30 + $0x80] sm:$0xff] }
  0x14   : > { %492 = vmatpush1.bf16.msra.mxu0 %v491_v14  ;;  %544 = vmatpush1.bf16.msra.mxu1 %v491_v14  ;;  %v184_v58 = vld [vmem:[%s630_s30 + $0x38] sm:$0xff]  ;;  %v183_v60 = vld [vmem:[%s630_s30 + $0x30] sm:$0xff]  ;;  %v186_v62 = vld [vmem:[%s630_s30 + $0x48] sm:$0xff] }
  0x15   : > { %493 = vmatprep.subr.bf16.mxu0 %v573_v3  ;;  %530 = vmatprep.subr.bf16.mxu1 %v573_v3  ;;  %v196_v59 = vld [vmem:[%s630_s30 + $0x98] sm:$0xff]  ;;  %v195_v61 = vld [vmem:[%s630_s30 + $0x90] sm:$0xff]  ;;  %v198_v63 = vld [vmem:[%s630_s30 + $0xa8] sm:$0xff] }
  0x16   : > { %v185_v0 = vld [vmem:[%s630_s30 + $0x40] sm:$0xff]  ;;  %v188_v2 = vld [vmem:[%s630_s30 + $0x58] sm:$0xff] }
  0x17   : > { %v197_v1 = vld [vmem:[%s630_s30 + $0xa0] sm:$0xff] }
  0x18   : > { %495 = vmatpush1.bf16.msra.mxu0 %v494_v17  ;;  %545 = vmatpush1.bf16.msra.mxu1 %v494_v17 }
  0x19   : > { %496 = vmatprep.subr.bf16.mxu0 %v573_v3  ;;  %531 = vmatprep.subr.bf16.mxu1 %v573_v3 }
  0x1c   : > { %498 = vmatpush1.bf16.msra.mxu0 %v497_v20  ;;  %546 = vmatpush1.bf16.msra.mxu1 %v497_v20 }
  0x1d   : > { %499 = vmatprep.subr.bf16.mxu0 %v573_v3  ;;  %532 = vmatprep.subr.bf16.mxu1 %v573_v3 }
  0x20   : > { %501 = vmatpush1.bf16.msra.mxu0 %v500_v23  ;;  %547 = vmatpush1.bf16.msra.mxu1 %v500_v23 }
  0x21   : > { %502 = vmatprep.subr.bf16.mxu0 %v573_v3  ;;  %533 = vmatprep.subr.bf16.mxu1 %v573_v3 }
  0x24   : > { %504 = vmatpush1.bf16.msra.mxu0 %v503_v26  ;;  %548 = vmatpush1.bf16.msra.mxu1 %v503_v26 }
  0x25   : > { %505 = vmatprep.subr.bf16.mxu0 %v573_v3  ;;  %534 = vmatprep.subr.bf16.mxu1 %v573_v3 }
  0x28   : > { %507 = vmatpush1.bf16.msra.mxu0 %v506_v29  ;;  %549 = vmatpush1.bf16.msra.mxu1 %v506_v29 }
  0x29   : > { %508 = vmatprep.subr.bf16.mxu0 %v573_v3  ;;  %535 = vmatprep.subr.bf16.mxu1 %v573_v3 }
  0x2c   : > { %510 = vmatpush1.bf16.msra.mxu0 %v509_v32  ;;  %550 = vmatpush1.bf16.msra.mxu1 %v509_v32 }
  0x2d   : > { %511 = vmatprep.subr.bf16.mxu0 %v573_v3  ;;  %536 = vmatprep.subr.bf16.mxu1 %v573_v3 }
  0x30   : > { %513 = vmatpush1.bf16.msra.mxu0 %v512_v35  ;;  %551 = vmatpush1.bf16.msra.mxu1 %v512_v35 }
  0x31   : > { %514 = vmatprep.subr.bf16.mxu0 %v573_v3  ;;  %537 = vmatprep.subr.bf16.mxu1 %v573_v3 }
  0x34   : > { %516 = vmatpush1.bf16.msra.mxu0 %v515_v38  ;;  %552 = vmatpush1.bf16.msra.mxu1 %v515_v38 }
  0x35   : > { %517 = vmatprep.subr.bf16.mxu0 %v573_v3  ;;  %538 = vmatprep.subr.bf16.mxu1 %v573_v3 }
  0x38   : > { %519 = vmatpush1.bf16.msra.mxu0 %v518_v41  ;;  %553 = vmatpush1.bf16.msra.mxu1 %v518_v41 }
  0x39   : > { %520 = vmatprep.subr.bf16.mxu0 %v573_v3  ;;  %539 = vmatprep.subr.bf16.mxu1 %v573_v3 }
  0x3c   : > { %522 = vmatpush1.bf16.msra.mxu0 %v521_v44  ;;  %554 = vmatpush1.bf16.msra.mxu1 %v521_v44 }
  0x3d   : > { %523 = vmatprep.subr.bf16.mxu0 %v573_v3  ;;  %540 = vmatprep.subr.bf16.mxu1 %v573_v3  ;;  %v187_v3 = vld [vmem:[%s630_s30 + $0x50] sm:$0xff] }
  0x40   : > { %525 = vmatpush1.bf16.msra.mxu0 %v524_v47  ;;  %555 = vmatpush1.bf16.msra.mxu1 %v524_v47 }
  0x43   : > { %335 = vmatmul.mubr.f32.vlgmr.msra.gmra.mrb[0].mxu0 %v177_v48  ;;  %365 = vmatmul.mubr.f32.vlgmr.msra.gmra.mrb[0].mxu1 %v189_v49 }
  0x44   : > { %468 = vmatprep.mubr.msk.f32.mxu0 %vm236_vm0, %v180_v50  ;;  %474 = vmatprep.mubr.msk.f32.mxu1 %vm236_vm0, %v192_v51 }
  0x47   : > { %340 = vmatmul.mubr.f32.gmra.mrb[2].mxu0 %v179_v52  ;;  %370 = vmatmul.mubr.f32.gmra.mrb[2].mxu1 %v191_v53 }
  0x48   : > { %469 = vmatprep.mubr.msk.f32.mxu0 %vm236_vm0, %v182_v54  ;;  %475 = vmatprep.mubr.msk.f32.mxu1 %vm236_vm0, %v194_v55 }
  0x4b   : > { %345 = vmatmul.mubr.f32.gmra.mrb[4].mxu0 %v181_v56  ;;  %375 = vmatmul.mubr.f32.gmra.mrb[4].mxu1 %v193_v57 }
  0x4c   : > { %470 = vmatprep.mubr.msk.f32.mxu0 %vm236_vm0, %v184_v58  ;;  %476 = vmatprep.mubr.msk.f32.mxu1 %vm236_vm0, %v196_v59 }
  0x4f   : > { %350 = vmatmul.mubr.f32.gmra.mrb[6].mxu0 %v183_v60  ;;  %380 = vmatmul.mubr.f32.gmra.mrb[6].mxu1 %v195_v61 }
  0x50   : > { %471 = vmatprep.mubr.msk.f32.mxu0 %vm236_vm0, %v186_v62  ;;  %477 = vmatprep.mubr.msk.f32.mxu1 %vm236_vm0, %v198_v63 }
  0x53   : > { %355 = vmatmul.mubr.f32.gmra.mrb[8].mxu0 %v185_v0  ;;  %385 = vmatmul.mubr.f32.gmra.mrb[8].mxu1 %v197_v1 }
  0x54   : > { %472 = vmatprep.mubr.msk.f32.mxu0 %vm236_vm0, %v188_v2 }
  0x57   : > { %360 = vmatmul.mubr.f32.gmra.mrb[10].mxu0 %v187_v3 }
 0x116   : > { %v336_v5 = vpop.f32.mrb[0].mxu0  ;;  %v366_v6 = vpop.f32.mrb[0].mxu1 }
 0x117   : > { %v337_v7 = vadd.f32 %v466_v4, %v336_v5  ;;  %v338_v8 = vpop.f32.mrb[1].mxu0  ;;  %v367_v9 = vadd.f32 %v466_v4, %v366_v6  ;;  %v368_v10 = vpop.f32.mrb[1].mxu1 }
 0x119   : > { %391 = vst.msk [vmem:[%s770_s9] sm:$0xff] %vm390_vm1, %v337_v7  ;;  %397 = vst.msk [vmem:[%s770_s9 + $0x30] sm:$0xff] %vm390_vm1, %v367_v9 }
 0x11a   : > { %v341_v11 = vpop.f32.mrb[2].mxu0  ;;  %v371_v12 = vpop.f32.mrb[2].mxu1 }
 0x11b   : > { %v342_v13 = vadd.f32 %v466_v4, %v341_v11  ;;  %v343_v14 = vpop.f32.mrb[3].mxu0  ;;  %v372_v15 = vadd.f32 %v466_v4, %v371_v12  ;;  %v373_v16 = vpop.f32.mrb[3].mxu1 }
 0x11d   : > { %392 = vst.msk [vmem:[%s770_s9 + $0x8] sm:$0xff] %vm390_vm1, %v342_v13  ;;  %398 = vst.msk [vmem:[%s770_s9 + $0x38] sm:$0xff] %vm390_vm1, %v372_v15 }
 0x11e   : > { %v346_v17 = vpop.f32.mrb[4].mxu0  ;;  %v376_v18 = vpop.f32.mrb[4].mxu1 }
 0x11f   : > { %v347_v19 = vadd.f32 %v466_v4, %v346_v17  ;;  %v348_v20 = vpop.f32.mrb[5].mxu0  ;;  %v377_v21 = vadd.f32 %v466_v4, %v376_v18  ;;  %v378_v22 = vpop.f32.mrb[5].mxu1 }
 0x121   : > { %393 = vst.msk [vmem:[%s770_s9 + $0x10] sm:$0xff] %vm390_vm1, %v347_v19  ;;  %399 = vst.msk [vmem:[%s770_s9 + $0x40] sm:$0xff] %vm390_vm1, %v377_v21 }
 0x122   : > { %v351_v23 = vpop.f32.mrb[6].mxu0  ;;  %v381_v24 = vpop.f32.mrb[6].mxu1 }
 0x123   : > { %v352_v25 = vadd.f32 %v466_v4, %v351_v23  ;;  %v353_v26 = vpop.f32.mrb[7].mxu0  ;;  %v382_v27 = vadd.f32 %v466_v4, %v381_v24  ;;  %v383_v28 = vpop.f32.mrb[7].mxu1 }
 0x125   : > { %394 = vst.msk [vmem:[%s770_s9 + $0x18] sm:$0xff] %vm390_vm1, %v352_v25  ;;  %400 = vst.msk [vmem:[%s770_s9 + $0x48] sm:$0xff] %vm390_vm1, %v382_v27 }
 0x126   : > { %v356_v29 = vpop.f32.mrb[8].mxu0  ;;  %v386_v30 = vpop.f32.mrb[8].mxu1 }
 0x127   : > { %v357_v31 = vadd.f32 %v466_v4, %v356_v29  ;;  %v358_v32 = vpop.f32.mrb[9].mxu0  ;;  %v387_v33 = vadd.f32 %v466_v4, %v386_v30  ;;  %v388_v34 = vpop.f32.mrb[9].mxu1 }
 0x129   : > { %395 = vst.msk [vmem:[%s770_s9 + $0x20] sm:$0xff] %vm390_vm1, %v357_v31  ;;  %401 = vst.msk [vmem:[%s770_s9 + $0x50] sm:$0xff] %vm390_vm1, %v387_v33 }
 0x12a   : > { %v361_v35 = vpop.f32.mrb[10].mxu0 }
 0x12b   : > { %v362_v36 = vadd.f32 %v466_v4, %v361_v35  ;;  %v363_v37 = vpop.f32.mrb[11].mxu0 }
 0x12d   : > { %396 = vst.msk [vmem:[%s770_s9 + $0x28] sm:$0xff] %vm390_vm1, %v362_v36 }
 0x12e PF: > { %s13_s12 = sadd.s32 1, %s571_s12  }
 0x12f   : > { %p10_p4 = scmp.ge.s32.totalorder %s13_s12, 4  }
 0x131   :  { %12 = sbr.rel (!%p10_p4) target bundleno = 1 (0x1), region = 62 }

// kernel: model_forward.14
= control target key start
LH: loop header
LB: loop body
LE: loop exit
PB: predicated region body
PF: predicated region fallthrough
CT: control target
= control target key end

     0   :  { %vm26_vm0 = vcmask 1041408   ;;  %vm27_vm1 = vcmask 1043458   ;;  %s101_s0 = inlined_call_operand.vmem [shape: f32[4,2,1280], index: 0, kind: input, shape index: {}]   ;;  %s102_s1 = inlined_call_operand.vmem [shape: f32[2,1280], index: 1, kind: output, shape index: {}]  }
   0x1   :  { %v8_v0 = vld [vmem:[%s101_s0] sm:$0xff]  ;;  %v11_v1 = vld [vmem:[%s101_s0 + $0x14] sm:$0xff]  ;;  %v14_v2 = vld [vmem:[%s101_s0 + $0x28] sm:$0xff] }
   0x2   :  { %v17_v3 = vld [vmem:[%s101_s0 + $0x3c] sm:$0xff]  ;;  %v20_v4 = vmax.f32 %v8_v0, %v14_v2  ;;  %v9_v5 = vld [vmem:[%s101_s0 + $0x8] sm:$0xff]  ;;  %v15_v8 = vld [vmem:[%s101_s0 + $0x30] sm:$0xff] }
   0x3   :  { %v12_v6 = vld [vmem:[%s101_s0 + $0x1c] sm:$0xff]  ;;  %v21_v7 = vmax.f32 %v11_v1, %v17_v3  ;;  %v18_v9 = vld [vmem:[%s101_s0 + $0x44] sm:$0xff]  ;;  %v10_v10 = vld [vmem:[%s101_s0 + $0x10] sm:$0xf]  ;;  %v23_v11 = vmax.f32 %v9_v5, %v15_v8 }
   0x4   :  { %v24_v12 = vmax.f32 %v12_v6, %v18_v9  ;;  %v13_v13 = vld [vmem:[%s101_s0 + $0x24] sm:$0xf]  ;;  %v16_v14 = vld [vmem:[%s101_s0 + $0x38] sm:$0xf]  ;;  %v19_v15 = vld [vmem:[%s101_s0 + $0x4c] sm:$0xf] }
   0x5   :  { %v22_v16 = vmax.f32 %v20_v4, %v21_v7  ;;  %vm28_vm2 = vmor %vm27_vm1, %vm26_vm0 }
   0x6   :  { %v25_v17 = vmax.f32 %v23_v11, %v24_v12  ;;  %v29_v18 = vsel %vm28_vm2, %v10_v10, -inf  ;;  %v30_v19 = vsel %vm28_vm2, %v13_v13, -inf  ;;  %v31_v20 = vsel %vm28_vm2, %v16_v14, -inf }
   0x7   :  { %v36_v21 = vmax.f32 %v22_v16, 0.0  ;;  %v32_v22 = vmax.f32 %v29_v18, %v31_v20  ;;  %v33_v23 = vsel %vm28_vm2, %v19_v15, -inf }
   0x8   :  { %v37_v24 = vmax.f32 %v25_v17, 0.0  ;;  %v34_v25 = vmax.f32 %v30_v19, %v33_v23 }
   0x9   :  { %39 = vst [vmem:[%s102_s1] sm:$0xff] %v36_v21 }
   0xa   :  { %40 = vst [vmem:[%s102_s1 + $0x8] sm:$0xff] %v37_v24  ;;  %v35_v26 = vmax.f32 %v32_v22, %v34_v25 }
   0xc   :  { %v38_v27 = vmax.f32 %v35_v26, 0.0 }
   0xe   :  { %41 = vst [vmem:[%s102_s1 + $0x10] sm:$0xf] %v38_v27 }

// kernel: model_forward.16
= control target key start
LH: loop header
LB: loop body
LE: loop exit
PB: predicated region body
PF: predicated region fallthrough
CT: control target
= control target key end

     0   :  { %vm12_vm0 = vcmask 812032   ;;  %s51_s0 = inlined_call_operand.vmem [shape: f32[4,2,100], index: 0, kind: input, shape index: {}]   ;;  %s52_s1 = inlined_call_operand.vmem [shape: f32[2,100], index: 1, kind: output, shape index: {}]  }
   0x1   :  { %v8_v0 = vld [vmem:[%s51_s0] sm:$0x3]  ;;  %v9_v1 = vld [vmem:[%s51_s0 + $0x2] sm:$0x3]  ;;  %v10_v2 = vld [vmem:[%s51_s0 + $0x4] sm:$0x3] }
   0x2   :  { %v11_v3 = vld [vmem:[%s51_s0 + $0x6] sm:$0x3]  ;;  %v13_v4 = vsel %vm12_vm0, %v8_v0, -inf  ;;  %v14_v5 = vsel %vm12_vm0, %v9_v1, -inf  ;;  %v15_v6 = vsel %vm12_vm0, %v10_v2, -inf }
   0x3   :  { %v16_v7 = vsel %vm12_vm0, %v11_v3, -inf  ;;  %v17_v8 = vmax.f32 %v13_v4, %v14_v5 }
   0x4   :  { %v18_v9 = vmax.f32 %v15_v6, %v16_v7 }
   0x6   :  { %v19_v10 = vmax.f32 %v17_v8, %v18_v9 }
   0x8   :  { %v20_v11 = vmax.f32 %v19_v10, 0.0 }
   0xa   :  { %21 = vst.msk [vmem:[%s52_s1] sm:$0x3] %vm12_vm0, %v20_v11 }

// kernel: model_forward.15
= control target key start
LH: loop header
LB: loop body
LE: loop exit
PB: predicated region body
PF: predicated region fallthrough
CT: control target
= control target key end

     0   :  { %v376_v3 = vmov 0.0|0.0   ;;  %vm377_vm0 = vmmov 0   ;;  %v378_v4 = vmov 0.0   ;;  %vm70_vm1 = vcmask 523264   ;;  %s571_s1 = inlined_call_operand.vmem [shape: f32[320,100], index: 1, kind: input, shape index: {}]   ;;  %s572_s0 = inlined_call_operand.vmem [shape: f32[24,320], index: 0, kind: input, shape index: {}]   ;;  %s573_s2 = inlined_call_operand.vmem [shape: f32[1,100], index: 2, kind: input, shape index: {}]   ;;  %s574_s3 = inlined_call_operand.vmem [shape: f32[24,100], index: 3, kind: output, shape index: {}]  }
   0x1   :  { %v39_v0 = vld [vmem:[%s571_s1 + $0x80] sm:$0xff]  ;;  %v40_v1 = vld [vmem:[%s571_s1 + $0x88] sm:$0xff]  ;;  %361 = vmatprep.subr.bf16.mxu1 %v376_v3  ;;  %320 = vmatprep.mubr.msk.f32.mxu1 %vm377_vm0, %v378_v4  ;;  %v41_v7 = vld [vmem:[%s571_s1 + $0x90] sm:$0xff]  ;;  %vm240_vm2 = vcmask 818176  }
   0x2   :  { %v23_v2 = vld [vmem:[%s571_s1] sm:$0xff]  ;;  %v329_v5 = vpack.c.bf16 %v40_v1, %v39_v0  ;;  %v24_v6 = vld [vmem:[%s571_s1 + $0x8] sm:$0xff]  ;;  %v42_v8 = vld [vmem:[%s571_s1 + $0x98] sm:$0xff] }
   0x3   :  { %v331_v9 = vpack.c.bf16 %v24_v6, %v23_v2  ;;  %v333_v10 = vpack.c.bf16 %v42_v8, %v41_v7  ;;  %v25_v11 = vld [vmem:[%s571_s1 + $0x10] sm:$0xff]  ;;  %v26_v12 = vld [vmem:[%s571_s1 + $0x18] sm:$0xff]  ;;  %v43_v13 = vld [vmem:[%s571_s1 + $0xa0] sm:$0xff] }
   0x4   :  { %330 = vmatprep.subr.bf16.mxu0 %v329_v5  ;;  %v44_v14 = vld [vmem:[%s571_s1 + $0xa8] sm:$0xff]  ;;  %v335_v15 = vpack.c.bf16 %v26_v12, %v25_v11  ;;  %v27_v17 = vld [vmem:[%s571_s1 + $0x20] sm:$0xff]  ;;  %v45_v19 = vld [vmem:[%s571_s1 + $0xb0] sm:$0xff] }
   0x5   :  { %332 = vmatpush3.bf16.msra.mxu0 %v331_v9  ;;  %v337_v16 = vpack.c.bf16 %v44_v14, %v43_v13  ;;  %v28_v18 = vld [vmem:[%s571_s1 + $0x28] sm:$0xff]  ;;  %v46_v20 = vld [vmem:[%s571_s1 + $0xb8] sm:$0xff]  ;;  %v55_v22 = vld [vmem:[%s571_s1 + $0x100] sm:$0xff] }
   0x6   :  { %334 = vmatprep.subr.bf16.mxu0 %v333_v10  ;;  %v339_v21 = vpack.c.bf16 %v28_v18, %v27_v17  ;;  %v56_v23 = vld [vmem:[%s571_s1 + $0x108] sm:$0xff]  ;;  %v341_v24 = vpack.c.bf16 %v46_v20, %v45_v19  ;;  %v29_v25 = vld [vmem:[%s571_s1 + $0x30] sm:$0xff]  ;;  %v30_v26 = vld [vmem:[%s571_s1 + $0x38] sm:$0xff] }
   0x7   :  { %v47_v27 = vld [vmem:[%s571_s1 + $0xc0] sm:$0xff]  ;;  %v362_v28 = vpack.c.bf16 %v56_v23, %v55_v22  ;;  %v48_v29 = vld [vmem:[%s571_s1 + $0xc8] sm:$0xff]  ;;  %v57_v30 = vld [vmem:[%s571_s1 + $0x110] sm:$0xff]  ;;  %v343_v33 = vpack.c.bf16 %v30_v26, %v29_v25 }
   0x8   :  { %v58_v31 = vld [vmem:[%s571_s1 + $0x118] sm:$0xff]  ;;  %v59_v34 = vld [vmem:[%s571_s1 + $0x120] sm:$0xff]  ;;  %v60_v35 = vld [vmem:[%s571_s1 + $0x128] sm:$0xff]  ;;  %v345_v37 = vpack.c.bf16 %v48_v29, %v47_v27 }
   0x9   :  { %336 = vmatpush3.bf16.msra.mxu0 %v335_v15  ;;  %363 = vmatpush3.bf16.msra.mxu1 %v362_v28  ;;  %v365_v32 = vpack.c.bf16 %v58_v31, %v57_v30  ;;  %v15_v36 = vld [vmem:[%s572_s0 + $0x8] sm:$0xff]  ;;  %v31_v38 = vld [vmem:[%s571_s1 + $0x40] sm:$0xff]  ;;  %v49_v40 = vld [vmem:[%s571_s1 + $0xd0] sm:$0xff]  ;;  %v368_v42 = vpack.c.bf16 %v60_v35, %v59_v34 }
   0xa   :  { %338 = vmatprep.subr.bf16.mxu0 %v337_v16  ;;  %364 = vmatprep.subr.bf16.mxu1 %v376_v3  ;;  %v32_v39 = vld [vmem:[%s571_s1 + $0x48] sm:$0xff]  ;;  %v50_v41 = vld [vmem:[%s571_s1 + $0xd8] sm:$0xff]  ;;  %v61_v44 = vld [vmem:[%s571_s1 + $0x130] sm:$0xff] }
   0xb   :  { %144 = vmatprep.mubr.f32.mxu0 %v15_v36  ;;  %v347_v43 = vpack.c.bf16 %v32_v39, %v31_v38  ;;  %v62_v45 = vld [vmem:[%s571_s1 + $0x138] sm:$0xff]  ;;  %v349_v46 = vpack.c.bf16 %v50_v41, %v49_v40  ;;  %v33_v47 = vld [vmem:[%s571_s1 + $0x50] sm:$0xff]  ;;  %v51_v49 = vld [vmem:[%s571_s1 + $0xe0] sm:$0xff] }
   0xc   :  { %v34_v48 = vld [vmem:[%s571_s1 + $0x58] sm:$0xff]  ;;  %v52_v50 = vld [vmem:[%s571_s1 + $0xe8] sm:$0xff]  ;;  %v371_v51 = vpack.c.bf16 %v62_v45, %v61_v44  ;;  %v35_v54 = vld [vmem:[%s571_s1 + $0x60] sm:$0xff] }
   0xd   :  { %340 = vmatpush3.bf16.msra.mxu0 %v339_v21  ;;  %366 = vmatpush3.bf16.msra.mxu1 %v365_v32  ;;  %v351_v52 = vpack.c.bf16 %v34_v48, %v33_v47  ;;  %v353_v53 = vpack.c.bf16 %v52_v50, %v51_v49  ;;  %v36_v55 = vld [vmem:[%s571_s1 + $0x68] sm:$0xff]  ;;  %v53_v56 = vld [vmem:[%s571_s1 + $0xf0] sm:$0xff]  ;;  %v54_v57 = vld [vmem:[%s571_s1 + $0xf8] sm:$0xff] }
   0xe   :  { %342 = vmatprep.subr.bf16.mxu0 %v341_v24  ;;  %367 = vmatprep.subr.bf16.mxu1 %v376_v3  ;;  %v16_v58 = vld [vmem:[%s572_s0 + $0x10] sm:$0xff]  ;;  %v355_v59 = vpack.c.bf16 %v36_v55, %v35_v54  ;;  %v357_v60 = vpack.c.bf16 %v54_v57, %v53_v56  ;;  %v38_v62 = vld [vmem:[%s571_s1 + $0x78] sm:$0xff]  ;;  %v19_v63 = vld [vmem:[%s572_s0 + $0x28] sm:$0xff] }
   0xf   :  { %v37_v61 = vld [vmem:[%s571_s1 + $0x70] sm:$0xff]  ;;  %v22_v1 = vld [vmem:[%s572_s0 + $0x40] sm:$0xff]  ;;  %v21_v5 = vld [vmem:[%s572_s0 + $0x38] sm:$0xff] }
  0x10   :  { %v359_v0 = vpack.c.bf16 %v38_v62, %v37_v61  ;;  %v14_v2 = vld [vmem:[%s572_s0] sm:$0xff]  ;;  %v20_v6 = vld [vmem:[%s572_s0 + $0x30] sm:$0xff] }
  0x11   :  { %344 = vmatpush3.bf16.msra.mxu0 %v343_v33  ;;  %369 = vmatpush3.bf16.msra.mxu1 %v368_v42  ;;  %v248_v15 = vld [vmem:[%s573_s2] ss:$0 sm:$0xff] }
  0x12   :  { %346 = vmatprep.subr.bf16.mxu0 %v345_v37  ;;  %370 = vmatprep.subr.bf16.mxu1 %v376_v3  ;;  %v18_v3 = vld [vmem:[%s572_s0 + $0x20] sm:$0xff] }
  0x15   :  { %348 = vmatpush3.bf16.msra.mxu0 %v347_v43  ;;  %372 = vmatpush3.bf16.msra.mxu1 %v371_v51 }
  0x16   :  { %350 = vmatprep.subr.bf16.mxu0 %v349_v46 }
  0x18   :  { %321 = vmatmul.mubr.msk.f32.vlgmr.msra.gmra.mrb[0].mxu1 %vm70_vm1, %v16_v58 }
  0x19   :  { %352 = vmatpush3.bf16.msra.mxu0 %v351_v52  ;;  %323 = vmatprep.mubr.msk.f32.mxu1 %vm377_vm0, %v378_v4 }
  0x1a   :  { %354 = vmatprep.subr.bf16.mxu0 %v353_v53 }
  0x1c   :  { %324 = vmatmul.mubr.msk.f32.gmra.mrb[2].mxu1 %vm70_vm1, %v19_v63 }
  0x1d   :  { %356 = vmatpush3.bf16.msra.mxu0 %v355_v59  ;;  %326 = vmatprep.mubr.msk.f32.mxu1 %vm377_vm0, %v378_v4  ;;  %v17_v4 = vld [vmem:[%s572_s0 + $0x18] sm:$0xff] }
  0x1e   :  { %358 = vmatprep.subr.bf16.mxu0 %v357_v60 }
  0x20   :  { %327 = vmatmul.mubr.msk.f32.gmra.mrb[4].mxu1 %vm70_vm1, %v22_v1 }
  0x21   :  { %360 = vmatpush3.bf16.msra.mxu0 %v359_v0 }
  0x24   :  { %145 = vmatmul.mubr.f32.vlgmr.msra.gmra.mrb[0].mxu0 %v14_v2 }
  0x25   :  { %149 = vmatprep.mubr.f32.mxu0 %v18_v3 }
  0x28   :  { %150 = vmatmul.mubr.f32.gmra.mrb[2].mxu0 %v17_v4 }
  0x29   :  { %154 = vmatprep.mubr.f32.mxu0 %v21_v5 }
  0x2c   :  { %155 = vmatmul.mubr.f32.gmra.mrb[4].mxu0 %v20_v6 }
  0xeb   :  { %v226_v7 = vpop.f32.mrb[0].mxu1 }
  0xec   :  { %v322_v8 = vpop.f32.mrb[1].mxu1 }
  0xef   :  { %v231_v9 = vpop.f32.mrb[2].mxu1 }
  0xf0   :  { %v325_v10 = vpop.f32.mrb[3].mxu1 }
  0xf3   :  { %v236_v11 = vpop.f32.mrb[4].mxu1 }
  0xf4   :  { %v328_v13 = vpop.f32.mrb[5].mxu1 }
  0xf7   :  { %v284_v12 = vpop.f32.mrb[0].mxu0 }
  0xf8   :  { %v285_v14 = vpop.f32.mrb[1].mxu0 }
  0xf9   :  { %v286_v16 = vadd.f32 %v285_v14, %v284_v12 }
  0xfb   :  { %v287_v17 = vpop.f32.mrb[2].mxu0  ;;  %v147_v18 = vadd.f32 %v286_v16, %v248_v15 }
  0xfc   :  { %v288_v19 = vpop.f32.mrb[3].mxu0 }
  0xfd   :  { %v227_v20 = vadd.f32 %v226_v7, %v147_v18  ;;  %v289_v21 = vadd.f32 %v288_v19, %v287_v17 }
  0xff   :  { %241 = vst.msk [vmem:[%s574_s3] sm:$0xff] %vm240_vm2, %v227_v20  ;;  %v290_v22 = vpop.f32.mrb[4].mxu0  ;;  %v152_v23 = vadd.f32 %v289_v21, %v248_v15 }
 0x100   :  { %v291_v24 = vpop.f32.mrb[5].mxu0 }
 0x101   :  { %v232_v25 = vadd.f32 %v231_v9, %v152_v23  ;;  %v292_v26 = vadd.f32 %v291_v24, %v290_v22 }
 0x103   :  { %242 = vst.msk [vmem:[%s574_s3 + $0x8] sm:$0xff] %vm240_vm2, %v232_v25  ;;  %v157_v27 = vadd.f32 %v292_v26, %v248_v15 }
 0x105   :  { %v237_v28 = vadd.f32 %v236_v11, %v157_v27 }
 0x107   :  { %243 = vst.msk [vmem:[%s574_s3 + $0x10] sm:$0xff] %vm240_vm2, %v237_v28 }

// kernel: model_forward.17
= control target key start
LH: loop header
LB: loop body
LE: loop exit
PB: predicated region body
PF: predicated region fallthrough
CT: control target
= control target key end

     0   :  { %v12_v0 = vlaneseq  ;;  %vm22_vm0 = vcmask 1040384   ;;  %vm25_vm1 = vcmask 1041408   ;;  %vm28_vm2 = vcmask 1042432   ;;  %s63_s0 = inlined_call_operand.vmem [shape: f32[2,1,1,100], index: 0, kind: input, shape index: {}]   ;;  %s64_s1 = inlined_call_operand.vmem [shape: f32[2,5,100], index: 1, kind: output, shape index: {}]  }
   0x1   :  { %v8_v2 = vld [vmem:[%s63_s0] sm:$0x1]  ;;  %v9_v3 = vld [vmem:[%s63_s0 + $0x1] sm:$0x1]  ;;  %vm31_vm3 = vcmask 1043456   ;;  %vm34_vm4 = vcmask 815104  }
   0x2   :  { %v13_v1 = vshrl.u32 %v12_v0, 7 }
   0x4   :  { %v14_v4 = vsub.s32 0, %v13_v1 }
   0x6   :  { %v15_v5 = vrot.slane %v8_v2, %v14_v4  ;;  %v19_v6 = vrot.slane %v9_v3, %v14_v4 }
   0x8   :  { %v23_v7 = vsel %vm22_vm0, %v8_v2, %v15_v5  ;;  %v24_v8 = vsel %vm22_vm0, %v9_v3, %v19_v6 }
   0x9   :  { %v26_v9 = vsel %vm25_vm1, %v23_v7, %v15_v5  ;;  %v27_v10 = vsel %vm25_vm1, %v24_v8, %v19_v6 }
   0xa   :  { %v29_v11 = vsel %vm28_vm2, %v26_v9, %v15_v5  ;;  %v30_v12 = vsel %vm28_vm2, %v27_v10, %v19_v6 }
   0xb   :  { %v32_v13 = vsel %vm31_vm3, %v29_v11, %v15_v5  ;;  %v33_v14 = vsel %vm31_vm3, %v30_v12, %v19_v6 }
   0xc   :  { %35 = vst.msk [vmem:[%s64_s1] sm:$0x1f] %vm34_vm4, %v32_v13  ;;  %36 = vst.msk [vmem:[%s64_s1 + $0x8] sm:$0x1f] %vm34_vm4, %v33_v14 }

// kernel: model_forward.19
= control target key start
LH: loop header
LB: loop body
LE: loop exit
PB: predicated region body
PF: predicated region fallthrough
CT: control target
= control target key end

     0   :  { %v173_v0 = vmov 0.0|0.0   ;;  %vm42_vm0 = vcmask 179200   ;;  %v174_v29 = vmov 0.0   ;;  %vm46_vm1 = vcmask 1045504   ;;  %s267_s1 = inlined_call_operand.vmem [shape: f32[150,10], index: 1, kind: input, shape index: {}]   ;;  %s268_s0 = inlined_call_operand.vmem [shape: f32[8,150], index: 0, kind: input, shape index: {}]   ;;  %s269_s2 = inlined_call_operand.vmem [shape: f32[1,10], index: 2, kind: input, shape index: {}]   ;;  %s270_s3 = inlined_call_operand.vmem [shape: f32[8,10], index: 3, kind: output, shape index: {}]  }
   0x1   :  { %140 = vmatprep.subr.bf16.mxu0 %v173_v0  ;;  %v16_v1 = vld [vmem:[%s267_s1] sm:$0xff]  ;;  %v17_v2 = vld [vmem:[%s267_s1 + $0x8] sm:$0xff]  ;;  %v18_v3 = vld [vmem:[%s267_s1 + $0x10] sm:$0xff]  ;;  %vm120_vm2 = vcmask 80896  }
   0x2   :  { %v141_v4 = vpack.c.bf16 %v17_v2, %v16_v1  ;;  %v19_v5 = vld [vmem:[%s267_s1 + $0x18] sm:$0xff]  ;;  %v20_v7 = vld [vmem:[%s267_s1 + $0x20] sm:$0xff]  ;;  %v21_v8 = vld [vmem:[%s267_s1 + $0x28] sm:$0xff] }
   0x3   :  { %v144_v6 = vpack.c.bf16 %v19_v5, %v18_v3  ;;  %v15_v9 = vld [vmem:[%s268_s0 + $0x8] sm:$0xff]  ;;  %v147_v10 = vpack.c.bf16 %v21_v8, %v20_v7  ;;  %v22_v11 = vld [vmem:[%s267_s1 + $0x30] sm:$0xff]  ;;  %v23_v12 = vld [vmem:[%s267_s1 + $0x38] sm:$0xff] }
   0x4   :  { %142 = vmatpush1.bf16.msra.mxu0 %v141_v4  ;;  %139 = vmatprep.mubr.msk.f32.mxu0 %vm42_vm0, %v15_v9  ;;  %v150_v13 = vpack.c.bf16 %v23_v12, %v22_v11  ;;  %v24_v14 = vld [vmem:[%s267_s1 + $0x40] sm:$0xff]  ;;  %v25_v15 = vld [vmem:[%s267_s1 + $0x48] sm:$0xff]  ;;  %v26_v17 = vld [vmem:[%s267_s1 + $0x50] sm:$0xff] }
   0x5   :  { %143 = vmatprep.subr.bf16.mxu0 %v173_v0  ;;  %v153_v16 = vpack.c.bf16 %v25_v15, %v24_v14  ;;  %v27_v18 = vld [vmem:[%s267_s1 + $0x58] sm:$0xff]  ;;  %v28_v20 = vld [vmem:[%s267_s1 + $0x60] sm:$0xff]  ;;  %v29_v21 = vld [vmem:[%s267_s1 + $0x68] sm:$0xff] }
   0x6   :  { %v156_v19 = vpack.c.bf16 %v27_v18, %v26_v17  ;;  %v159_v22 = vpack.c.bf16 %v29_v21, %v28_v20  ;;  %v30_v23 = vld [vmem:[%s267_s1 + $0x70] sm:$0xff]  ;;  %v31_v24 = vld [vmem:[%s267_s1 + $0x78] sm:$0xff]  ;;  %v32_v26 = vld [vmem:[%s267_s1 + $0x80] sm:$0xff] }
   0x7   :  { %v162_v25 = vpack.c.bf16 %v31_v24, %v30_v23  ;;  %v33_v27 = vld [vmem:[%s267_s1 + $0x88] sm:$0xff]  ;;  %v34_v30 = vld [vmem:[%s267_s1 + $0x90] sm:$0x3f]  ;;  %v14_v31 = vld [vmem:[%s268_s0] sm:$0xff] }
   0x8   :  { %145 = vmatpush1.bf16.msra.mxu0 %v144_v6  ;;  %v165_v28 = vpack.c.bf16 %v33_v27, %v32_v26  ;;  %v137_v32 = vld [vmem:[%s269_s2] ss:$0 sm:$0xff] }
   0x9   :  { %146 = vmatprep.subr.bf16.mxu0 %v173_v0 }
   0xc   :  { %148 = vmatpush1.bf16.msra.mxu0 %v147_v10 }
   0xd   :  { %149 = vmatprep.subr.bf16.mxu0 %v173_v0 }
  0x10   :  { %151 = vmatpush1.bf16.msra.mxu0 %v150_v13 }
  0x11   :  { %152 = vmatprep.subr.bf16.mxu0 %v173_v0 }
  0x14   :  { %154 = vmatpush1.bf16.msra.mxu0 %v153_v16 }
  0x15   :  { %155 = vmatprep.subr.bf16.mxu0 %v173_v0 }
  0x18   :  { %157 = vmatpush1.bf16.msra.mxu0 %v156_v19 }
  0x19   :  { %158 = vmatprep.subr.bf16.mxu0 %v173_v0 }
  0x1c   :  { %160 = vmatpush1.bf16.msra.mxu0 %v159_v22 }
  0x1d   :  { %161 = vmatprep.subr.bf16.mxu0 %v173_v0 }
  0x20   :  { %163 = vmatpush1.bf16.msra.mxu0 %v162_v25 }
  0x21   :  { %164 = vmatprep.subr.bf16.mxu0 %v173_v0 }
  0x24   :  { %166 = vmatpush1.bf16.msra.mxu0 %v165_v28 }
  0x25   :  { %86 = vmatprep.subr.mxu0 %v174_v29 }
  0x28   :  { %138 = vmatpush1.msk.msra.mxu0 %vm46_vm1, %v34_v30 }
  0x29   :  { %115 = vmatmul.mubr.f32.vlgmr.msra.gmra.mrb[0].mxu0 %v14_v31 }
  0xfc   :  { %v116_v33 = vpop.f32.mrb[0].mxu0 }
  0xfd   :  { %v117_v34 = vadd.f32 %v137_v32, %v116_v33  ;;  %v118_v35 = vpop.f32.mrb[1].mxu0 }
  0xff   :  { %v121_v36 = vsel %vm120_vm2, %v117_v34, -inf }
 0x100   :  { %122 = vmax.xlane.f32.xlu0 %v121_v36 }
 0x18d   :  { %v123_v37 = vpop.xlane.xlu0 %122 }
 0x18e   :  { %v124_v38 = vsub.f32 %v117_v34, %v123_v37 }
 0x190   :  { %v125_v39 = vmul.f32 1.442695, %v124_v38 }
 0x192   :  { %169 = vpow2.f32 %v125_v39 }
 0x19c   :  { %v170_v40 = vpop.eup %169 }
 0x19d   :  { %v127_v41 = vsel %vm120_vm2, %v170_v40, 0.0 }
 0x19e   :  { %128 = vadd.xlane.f32.xlu0 %v127_v41 }
 0x22b   :  { %v129_v42 = vpop.xlane.xlu0 %128 }
 0x22c   :  { %171 = vrcp.f32 %v129_v42 }
 0x236   :  { %v172_v43 = vpop.eup %171 }
 0x237   :  { %v131_v44 = vmul.f32 %v172_v43, %v170_v40 }
 0x239   :  { %132 = vst.msk [vmem:[%s270_s3] sm:$0xff] %vm120_vm2, %v131_v44 }

// kernel: model_forward.18
= control target key start
LH: loop header
LB: loop body
LE: loop exit
PB: predicated region body
PF: predicated region fallthrough
CT: control target
= control target key end

     0   :  { %vm156_vm0 = vcmask 949248   ;;  %vm160_vm1 = vcmask 1043456   ;;  %vm312_vm2 = vcmask 179200   ;;  %s869_s1 = inlined_call_operand.vmem [shape: f32[500,150], index: 1, kind: input, shape index: {}]   ;;  %s870_s0 = inlined_call_operand.vmem [shape: f32[8,500], index: 0, kind: input, shape index: {}]   ;;  %s871_s2 = inlined_call_operand.vmem [shape: f32[1,150], index: 2, kind: input, shape index: {}]   ;;  %s872_s3 = inlined_call_operand.vmem [shape: f32[8,150], index: 3, kind: output, shape index: {}]  }
   0x1   :  { %v19_v0 = vld [vmem:[%s869_s1 + $0x8] sm:$0xff]  ;;  %v21_v1 = vld [vmem:[%s869_s1 + $0x18] sm:$0xff]  ;;  %v18_v2 = vld [vmem:[%s869_s1] sm:$0xff] }
   0x2   :  { %v321_v3 = vpack.c.bf16 %v21_v1, %v19_v0  ;;  %v20_v4 = vld [vmem:[%s869_s1 + $0x10] sm:$0xff]  ;;  %v83_v5 = vld [vmem:[%s869_s1 + $0x208] sm:$0xff]  ;;  %v85_v6 = vld [vmem:[%s869_s1 + $0x218] sm:$0xff] }
   0x3   :  { %v323_v7 = vpack.c.bf16 %v20_v4, %v18_v2  ;;  %v385_v8 = vpack.c.bf16 %v85_v6, %v83_v5  ;;  %v23_v9 = vld [vmem:[%s869_s1 + $0x28] sm:$0xff]  ;;  %v25_v10 = vld [vmem:[%s869_s1 + $0x38] sm:$0xff]  ;;  %v82_v11 = vld [vmem:[%s869_s1 + $0x200] sm:$0xff] }
   0x4   :  { %322 = vmatprep.subr.bf16.mxu1 %v321_v3  ;;  %v325_v12 = vpack.c.bf16 %v25_v10, %v23_v9  ;;  %v84_v13 = vld [vmem:[%s869_s1 + $0x210] sm:$0xff]  ;;  %v22_v14 = vld [vmem:[%s869_s1 + $0x20] sm:$0xff]  ;;  %v87_v18 = vld [vmem:[%s869_s1 + $0x228] sm:$0xff] }
   0x5   :  { %v24_v15 = vld [vmem:[%s869_s1 + $0x30] sm:$0xff]  ;;  %324 = vmatpush1.bf16.msra.mxu1 %v323_v7  ;;  %386 = vmatprep.subr.bf16.mxu0 %v385_v8  ;;  %v387_v16 = vpack.c.bf16 %v84_v13, %v82_v11  ;;  %v89_v19 = vld [vmem:[%s869_s1 + $0x238] sm:$0xff]  ;;  %v27_v20 = vld [vmem:[%s869_s1 + $0x48] sm:$0xff] }
   0x6   :  { %v327_v17 = vpack.c.bf16 %v24_v15, %v22_v14  ;;  %326 = vmatprep.subr.bf16.mxu1 %v325_v12  ;;  %v389_v21 = vpack.c.bf16 %v89_v19, %v87_v18  ;;  %v29_v22 = vld [vmem:[%s869_s1 + $0x58] sm:$0xff]  ;;  %v86_v23 = vld [vmem:[%s869_s1 + $0x220] sm:$0xff]  ;;  %v88_v24 = vld [vmem:[%s869_s1 + $0x230] sm:$0xff] }
   0x7   :  { %388 = vmatpush1.bf16.msra.mxu0 %v387_v16  ;;  %v329_v25 = vpack.c.bf16 %v29_v22, %v27_v20  ;;  %v391_v26 = vpack.c.bf16 %v88_v24, %v86_v23  ;;  %v26_v27 = vld [vmem:[%s869_s1 + $0x40] sm:$0xff]  ;;  %v28_v28 = vld [vmem:[%s869_s1 + $0x50] sm:$0xff]  ;;  %v91_v29 = vld [vmem:[%s869_s1 + $0x248] sm:$0xff] }
   0x8   :  { %390 = vmatprep.subr.bf16.mxu0 %v389_v21  ;;  %v93_v30 = vld [vmem:[%s869_s1 + $0x258] sm:$0xff]  ;;  %v31_v31 = vld [vmem:[%s869_s1 + $0x68] sm:$0xff]  ;;  %v331_v33 = vpack.c.bf16 %v28_v28, %v26_v27  ;;  %v90_v35 = vld [vmem:[%s869_s1 + $0x240] sm:$0xff] }
   0x9   :  { %v33_v32 = vld [vmem:[%s869_s1 + $0x78] sm:$0xff]  ;;  %328 = vmatpush1.bf16.msra.mxu1 %v327_v17  ;;  %v393_v34 = vpack.c.bf16 %v93_v30, %v91_v29  ;;  %v92_v36 = vld [vmem:[%s869_s1 + $0x250] sm:$0xff]  ;;  %v30_v37 = vld [vmem:[%s869_s1 + $0x60] sm:$0xff] }
   0xa   :  { %330 = vmatprep.subr.bf16.mxu1 %v329_v25  ;;  %v333_v38 = vpack.c.bf16 %v33_v32, %v31_v31  ;;  %v32_v39 = vld [vmem:[%s869_s1 + $0x70] sm:$0xff]  ;;  %v95_v40 = vld [vmem:[%s869_s1 + $0x268] sm:$0xff]  ;;  %v97_v41 = vld [vmem:[%s869_s1 + $0x278] sm:$0xff]  ;;  %v395_v42 = vpack.c.bf16 %v92_v36, %v90_v35 }
   0xb   :  { %392 = vmatpush1.bf16.msra.mxu0 %v391_v26  ;;  %v35_v43 = vld [vmem:[%s869_s1 + $0x88] sm:$0xff]  ;;  %v37_v44 = vld [vmem:[%s869_s1 + $0x98] sm:$0xff]  ;;  %v397_v45 = vpack.c.bf16 %v97_v41, %v95_v40  ;;  %v94_v46 = vld [vmem:[%s869_s1 + $0x260] sm:$0xff]  ;;  %v335_v48 = vpack.c.bf16 %v32_v39, %v30_v37 }
   0xc   :  { %394 = vmatprep.subr.bf16.mxu0 %v393_v34  ;;  %v96_v47 = vld [vmem:[%s869_s1 + $0x270] sm:$0xff]  ;;  %v99_v49 = vld [vmem:[%s869_s1 + $0x288] sm:$0xff]  ;;  %v101_v50 = vld [vmem:[%s869_s1 + $0x298] sm:$0xff]  ;;  %v337_v51 = vpack.c.bf16 %v37_v44, %v35_v43 }
   0xd   :  { %332 = vmatpush1.bf16.msra.mxu1 %v331_v33  ;;  %v34_v52 = vld [vmem:[%s869_s1 + $0x80] sm:$0xff]  ;;  %v36_v53 = vld [vmem:[%s869_s1 + $0x90] sm:$0xff]  ;;  %v399_v54 = vpack.c.bf16 %v96_v47, %v94_v46  ;;  %v39_v55 = vld [vmem:[%s869_s1 + $0xa8] sm:$0xff]  ;;  %v401_v57 = vpack.c.bf16 %v101_v50, %v99_v49 }
   0xe   :  { %334 = vmatprep.subr.bf16.mxu1 %v333_v38  ;;  %v41_v56 = vld [vmem:[%s869_s1 + $0xb8] sm:$0xff]  ;;  %v98_v58 = vld [vmem:[%s869_s1 + $0x280] sm:$0xff]  ;;  %v100_v59 = vld [vmem:[%s869_s1 + $0x290] sm:$0xff]  ;;  %v339_v60 = vpack.c.bf16 %v36_v53, %v34_v52 }
   0xf   :  { %396 = vmatpush1.bf16.msra.mxu0 %v395_v42  ;;  %v103_v61 = vld [vmem:[%s869_s1 + $0x2a8] sm:$0xff]  ;;  %v105_v62 = vld [vmem:[%s869_s1 + $0x2b8] sm:$0xff]  ;;  %v341_v63 = vpack.c.bf16 %v41_v56, %v39_v55  ;;  %v38_v0 = vld [vmem:[%s869_s1 + $0xa0] sm:$0xff]  ;;  %v403_v2 = vpack.c.bf16 %v100_v59, %v98_v58 }
  0x10   :  { %398 = vmatprep.subr.bf16.mxu0 %v397_v45  ;;  %v40_v1 = vld [vmem:[%s869_s1 + $0xb0] sm:$0xff]  ;;  %v43_v3 = vld [vmem:[%s869_s1 + $0xc8] sm:$0xff]  ;;  %v45_v4 = vld [vmem:[%s869_s1 + $0xd8] sm:$0xff]  ;;  %v405_v5 = vpack.c.bf16 %v105_v62, %v103_v61 }
  0x11   :  { %336 = vmatpush1.bf16.msra.mxu1 %v335_v48  ;;  %v102_v6 = vld [vmem:[%s869_s1 + $0x2a0] sm:$0xff]  ;;  %v104_v7 = vld [vmem:[%s869_s1 + $0x2b0] sm:$0xff]  ;;  %v343_v8 = vpack.c.bf16 %v40_v1, %v38_v0  ;;  %v107_v9 = vld [vmem:[%s869_s1 + $0x2c8] sm:$0xff]  ;;  %v345_v11 = vpack.c.bf16 %v45_v4, %v43_v3 }
  0x12   :  { %338 = vmatprep.subr.bf16.mxu1 %v337_v51  ;;  %v109_v10 = vld [vmem:[%s869_s1 + $0x2d8] sm:$0xff]  ;;  %v42_v12 = vld [vmem:[%s869_s1 + $0xc0] sm:$0xff]  ;;  %v44_v13 = vld [vmem:[%s869_s1 + $0xd0] sm:$0xff]  ;;  %v407_v14 = vpack.c.bf16 %v104_v7, %v102_v6 }
  0x13   :  { %400 = vmatpush1.bf16.msra.mxu0 %v399_v54  ;;  %v47_v15 = vld [vmem:[%s869_s1 + $0xe8] sm:$0xff]  ;;  %v49_v16 = vld [vmem:[%s869_s1 + $0xf8] sm:$0xff]  ;;  %v409_v17 = vpack.c.bf16 %v109_v10, %v107_v9  ;;  %v106_v18 = vld [vmem:[%s869_s1 + $0x2c0] sm:$0xff]  ;;  %v347_v20 = vpack.c.bf16 %v44_v13, %v42_v12 }
  0x14   :  { %402 = vmatprep.subr.bf16.mxu0 %v401_v57  ;;  %v108_v19 = vld [vmem:[%s869_s1 + $0x2d0] sm:$0xff]  ;;  %v111_v21 = vld [vmem:[%s869_s1 + $0x2e8] sm:$0xff]  ;;  %v113_v22 = vld [vmem:[%s869_s1 + $0x2f8] sm:$0xff]  ;;  %v349_v23 = vpack.c.bf16 %v49_v16, %v47_v15 }
  0x15   :  { %340 = vmatpush1.bf16.msra.mxu1 %v339_v60  ;;  %v46_v24 = vld [vmem:[%s869_s1 + $0xe0] sm:$0xff]  ;;  %v48_v25 = vld [vmem:[%s869_s1 + $0xf0] sm:$0xff]  ;;  %v411_v26 = vpack.c.bf16 %v108_v19, %v106_v18  ;;  %v51_v27 = vld [vmem:[%s869_s1 + $0x108] sm:$0xff]  ;;  %v413_v29 = vpack.c.bf16 %v113_v22, %v111_v21 }
  0x16   :  { %342 = vmatprep.subr.bf16.mxu1 %v341_v63  ;;  %v53_v28 = vld [vmem:[%s869_s1 + $0x118] sm:$0xff]  ;;  %v110_v30 = vld [vmem:[%s869_s1 + $0x2e0] sm:$0xff]  ;;  %v112_v31 = vld [vmem:[%s869_s1 + $0x2f0] sm:$0xff]  ;;  %v351_v32 = vpack.c.bf16 %v48_v25, %v46_v24 }
  0x17   :  { %404 = vmatpush1.bf16.msra.mxu0 %v403_v2  ;;  %v115_v33 = vld [vmem:[%s869_s1 + $0x308] sm:$0xff]  ;;  %v117_v34 = vld [vmem:[%s869_s1 + $0x318] sm:$0xff]  ;;  %v353_v35 = vpack.c.bf16 %v53_v28, %v51_v27  ;;  %v50_v36 = vld [vmem:[%s869_s1 + $0x100] sm:$0xff]  ;;  %v415_v38 = vpack.c.bf16 %v112_v31, %v110_v30 }
  0x18   :  { %406 = vmatprep.subr.bf16.mxu0 %v405_v5  ;;  %v52_v37 = vld [vmem:[%s869_s1 + $0x110] sm:$0xff]  ;;  %v55_v39 = vld [vmem:[%s869_s1 + $0x128] sm:$0xff]  ;;  %v57_v40 = vld [vmem:[%s869_s1 + $0x138] sm:$0xff]  ;;  %v417_v41 = vpack.c.bf16 %v117_v34, %v115_v33 }
  0x19   :  { %344 = vmatpush1.bf16.msra.mxu1 %v343_v8  ;;  %v114_v42 = vld [vmem:[%s869_s1 + $0x300] sm:$0xff]  ;;  %v116_v43 = vld [vmem:[%s869_s1 + $0x310] sm:$0xff]  ;;  %v355_v44 = vpack.c.bf16 %v52_v37, %v50_v36  ;;  %v119_v45 = vld [vmem:[%s869_s1 + $0x328] sm:$0xff]  ;;  %v357_v47 = vpack.c.bf16 %v57_v40, %v55_v39 }
  0x1a   :  { %346 = vmatprep.subr.bf16.mxu1 %v345_v11  ;;  %v121_v46 = vld [vmem:[%s869_s1 + $0x338] sm:$0xff]  ;;  %v54_v48 = vld [vmem:[%s869_s1 + $0x120] sm:$0xff]  ;;  %v56_v49 = vld [vmem:[%s869_s1 + $0x130] sm:$0xff]  ;;  %v419_v50 = vpack.c.bf16 %v116_v43, %v114_v42 }
  0x1b   :  { %408 = vmatpush1.bf16.msra.mxu0 %v407_v14  ;;  %v59_v51 = vld [vmem:[%s869_s1 + $0x148] sm:$0xff]  ;;  %v61_v52 = vld [vmem:[%s869_s1 + $0x158] sm:$0xff]  ;;  %v421_v53 = vpack.c.bf16 %v121_v46, %v119_v45  ;;  %v118_v54 = vld [vmem:[%s869_s1 + $0x320] sm:$0xff]  ;;  %v359_v56 = vpack.c.bf16 %v56_v49, %v54_v48 }
  0x1c   :  { %410 = vmatprep.subr.bf16.mxu0 %v409_v17  ;;  %v120_v55 = vld [vmem:[%s869_s1 + $0x330] sm:$0xff]  ;;  %v123_v57 = vld [vmem:[%s869_s1 + $0x348] sm:$0xff]  ;;  %v125_v58 = vld [vmem:[%s869_s1 + $0x358] sm:$0xff]  ;;  %v361_v59 = vpack.c.bf16 %v61_v52, %v59_v51 }
  0x1d   :  { %348 = vmatpush1.bf16.msra.mxu1 %v347_v20  ;;  %v58_v60 = vld [vmem:[%s869_s1 + $0x140] sm:$0xff]  ;;  %v60_v61 = vld [vmem:[%s869_s1 + $0x150] sm:$0xff]  ;;  %v423_v62 = vpack.c.bf16 %v120_v55, %v118_v54  ;;  %v63_v63 = vld [vmem:[%s869_s1 + $0x168] sm:$0xff]  ;;  %v425_v1 = vpack.c.bf16 %v125_v58, %v123_v57 }
  0x1e   :  { %350 = vmatprep.subr.bf16.mxu1 %v349_v23  ;;  %v65_v0 = vld [vmem:[%s869_s1 + $0x178] sm:$0xff]  ;;  %v122_v2 = vld [vmem:[%s869_s1 + $0x340] sm:$0xff]  ;;  %v124_v3 = vld [vmem:[%s869_s1 + $0x350] sm:$0xff]  ;;  %v363_v4 = vpack.c.bf16 %v60_v61, %v58_v60 }
  0x1f   :  { %412 = vmatpush1.bf16.msra.mxu0 %v411_v26  ;;  %v127_v5 = vld [vmem:[%s869_s1 + $0x368] sm:$0xff]  ;;  %v129_v6 = vld [vmem:[%s869_s1 + $0x378] sm:$0xff]  ;;  %v365_v7 = vpack.c.bf16 %v65_v0, %v63_v63  ;;  %v62_v8 = vld [vmem:[%s869_s1 + $0x160] sm:$0xff]  ;;  %v427_v11 = vpack.c.bf16 %v124_v3, %v122_v2  ;;  %v146_v0 = vlaneseq }
  0x20   :  { %414 = vmatprep.subr.bf16.mxu0 %v413_v29  ;;  %v64_v9 = vld [vmem:[%s869_s1 + $0x170] sm:$0xff]  ;;  %v15_v10 = vld [vmem:[%s870_s0 + $0x8] sm:$0xff]  ;;  %v69_v13 = vld [vmem:[%s869_s1 + $0x198] sm:$0xff]  ;;  %v429_v15 = vpack.c.bf16 %v129_v6, %v127_v5 }
  0x21   :  { %352 = vmatpush1.bf16.msra.mxu1 %v351_v32  ;;  %v67_v12 = vld [vmem:[%s869_s1 + $0x188] sm:$0xff]  ;;  %231 = vmatprep.mubr.f32.mxu1 %v15_v10  ;;  %v17_v14 = vld [vmem:[%s870_s0 + $0x18] sm:$0xff]  ;;  %v126_v16 = vld [vmem:[%s869_s1 + $0x360] sm:$0xff]  ;;  %v367_v18 = vpack.c.bf16 %v64_v9, %v62_v8 }
  0x22   :  { %354 = vmatprep.subr.bf16.mxu1 %v353_v35  ;;  %v128_v17 = vld [vmem:[%s869_s1 + $0x370] sm:$0xff]  ;;  %320 = vmatprep.mubr.msk.f32.mxu0 %vm156_vm0, %v17_v14  ;;  %v131_v19 = vld [vmem:[%s869_s1 + $0x388] sm:$0xff]  ;;  %v133_v20 = vld [vmem:[%s869_s1 + $0x398] sm:$0xff]  ;;  %v369_v21 = vpack.c.bf16 %v69_v13, %v67_v12 }
  0x23   :  { %416 = vmatpush1.bf16.msra.mxu0 %v415_v38  ;;  %v66_v22 = vld [vmem:[%s869_s1 + $0x180] sm:$0xff]  ;;  %v68_v23 = vld [vmem:[%s869_s1 + $0x190] sm:$0xff]  ;;  %v431_v24 = vpack.c.bf16 %v128_v17, %v126_v16  ;;  %v71_v25 = vld [vmem:[%s869_s1 + $0x1a8] sm:$0xff]  ;;  %v433_v27 = vpack.c.bf16 %v133_v20, %v131_v19 }
  0x24   :  { %418 = vmatprep.subr.bf16.mxu0 %v417_v41  ;;  %v73_v26 = vld [vmem:[%s869_s1 + $0x1b8] sm:$0xff]  ;;  %v130_v28 = vld [vmem:[%s869_s1 + $0x380] sm:$0xff]  ;;  %v132_v29 = vld [vmem:[%s869_s1 + $0x390] sm:$0xff]  ;;  %v371_v30 = vpack.c.bf16 %v68_v23, %v66_v22 }
  0x25   :  { %356 = vmatpush1.bf16.msra.mxu1 %v355_v44  ;;  %v135_v31 = vld [vmem:[%s869_s1 + $0x3a8] sm:$0xff]  ;;  %v137_v32 = vld [vmem:[%s869_s1 + $0x3b8] sm:$0xff]  ;;  %v373_v33 = vpack.c.bf16 %v73_v26, %v71_v25  ;;  %v70_v34 = vld [vmem:[%s869_s1 + $0x1a0] sm:$0xff]  ;;  %v435_v36 = vpack.c.bf16 %v132_v29, %v130_v28 }
  0x26   :  { %358 = vmatprep.subr.bf16.mxu1 %v357_v47  ;;  %v72_v35 = vld [vmem:[%s869_s1 + $0x1b0] sm:$0xff]  ;;  %v75_v37 = vld [vmem:[%s869_s1 + $0x1c8] sm:$0xff]  ;;  %v77_v38 = vld [vmem:[%s869_s1 + $0x1d8] sm:$0xff]  ;;  %v437_v39 = vpack.c.bf16 %v137_v32, %v135_v31 }
  0x27   :  { %420 = vmatpush1.bf16.msra.mxu0 %v419_v50  ;;  %v134_v40 = vld [vmem:[%s869_s1 + $0x3a0] sm:$0xff]  ;;  %v136_v41 = vld [vmem:[%s869_s1 + $0x3b0] sm:$0xff]  ;;  %v375_v42 = vpack.c.bf16 %v72_v35, %v70_v34  ;;  %v139_v43 = vld [vmem:[%s869_s1 + $0x3c8] sm:$0xff]  ;;  %v377_v45 = vpack.c.bf16 %v77_v38, %v75_v37 }
  0x28   :  { %422 = vmatprep.subr.bf16.mxu0 %v421_v53  ;;  %v141_v44 = vld [vmem:[%s869_s1 + $0x3d8] sm:$0xff]  ;;  %v74_v46 = vld [vmem:[%s869_s1 + $0x1c0] sm:$0xff]  ;;  %v76_v47 = vld [vmem:[%s869_s1 + $0x1d0] sm:$0xff]  ;;  %v439_v48 = vpack.c.bf16 %v136_v41, %v134_v40 }
  0x29   :  { %360 = vmatpush1.bf16.msra.mxu1 %v359_v56  ;;  %v79_v49 = vld [vmem:[%s869_s1 + $0x1e8] sm:$0xff]  ;;  %v81_v50 = vld [vmem:[%s869_s1 + $0x1f8] sm:$0xff]  ;;  %v441_v51 = vpack.c.bf16 %v141_v44, %v139_v43  ;;  %v138_v52 = vld [vmem:[%s869_s1 + $0x3c0] sm:$0xff]  ;;  %v379_v54 = vpack.c.bf16 %v76_v47, %v74_v46 }
  0x2a   :  { %362 = vmatprep.subr.bf16.mxu1 %v361_v59  ;;  %v140_v53 = vld [vmem:[%s869_s1 + $0x3d0] sm:$0xff]  ;;  %v381_v55 = vpack.c.bf16 %v81_v50, %v79_v49  ;;  %v78_v56 = vld [vmem:[%s869_s1 + $0x1e0] sm:$0xff]  ;;  %v143_v60 = vld [vmem:[%s869_s1 + $0x3e8] sm:$0xf] }
  0x2b   :  { %424 = vmatpush1.bf16.msra.mxu0 %v423_v62  ;;  %v80_v57 = vld [vmem:[%s869_s1 + $0x1f0] sm:$0xff]  ;;  %v443_v58 = vpack.c.bf16 %v140_v53, %v138_v52  ;;  %v142_v61 = vld [vmem:[%s869_s1 + $0x3e0] sm:$0xf] }
  0x2c   :  { %426 = vmatprep.subr.bf16.mxu0 %v425_v1  ;;  %v383_v59 = vpack.c.bf16 %v80_v57, %v78_v56  ;;  %v14_v62 = vld [vmem:[%s870_s0] sm:$0xff]  ;;  %v16_v63 = vld [vmem:[%s870_s0 + $0x10] sm:$0xff]  ;;  %v147_v1 = vshrl.u32 %v146_v0, 7 }
  0x2d   :  { %364 = vmatpush1.bf16.msra.mxu1 %v363_v4  ;;  %v144_v3 = vld [vmem:[%s871_s2] sm:$0x3] }
  0x2e   :  { %366 = vmatprep.subr.bf16.mxu1 %v365_v7  ;;  %v148_v2 = vsub.s32 0, %v147_v1  ;;  %v152_v4 = vsub.s32 1, %v147_v1 }
  0x2f   :  { %428 = vmatpush1.bf16.msra.mxu0 %v427_v11 }
  0x30   :  { %430 = vmatprep.subr.bf16.mxu0 %v429_v15  ;;  %v149_v5 = vrot.slane %v144_v3, %v148_v2  ;;  %v153_v6 = vrot.slane %v144_v3, %v152_v4 }
  0x31   :  { %368 = vmatpush1.bf16.msra.mxu1 %v367_v18 }
  0x32   :  { %370 = vmatprep.subr.bf16.mxu1 %v369_v21 }
  0x33   :  { %432 = vmatpush1.bf16.msra.mxu0 %v431_v24 }
  0x34   :  { %434 = vmatprep.subr.bf16.mxu0 %v433_v27 }
  0x35   :  { %372 = vmatpush1.bf16.msra.mxu1 %v371_v30 }
  0x36   :  { %374 = vmatprep.subr.bf16.mxu1 %v373_v33 }
  0x37   :  { %436 = vmatpush1.bf16.msra.mxu0 %v435_v36 }
  0x38   :  { %438 = vmatprep.subr.bf16.mxu0 %v437_v39 }
  0x39   :  { %376 = vmatpush1.bf16.msra.mxu1 %v375_v42 }
  0x3a   :  { %378 = vmatprep.subr.bf16.mxu1 %v377_v45 }
  0x3b   :  { %440 = vmatpush1.bf16.msra.mxu0 %v439_v48 }
  0x3c   :  { %442 = vmatprep.subr.bf16.mxu0 %v441_v51 }
  0x3d   :  { %380 = vmatpush1.bf16.msra.mxu1 %v379_v54 }
  0x3e   :  { %382 = vmatprep.subr.bf16.mxu1 %v381_v55 }
  0x3f   :  { %444 = vmatpush1.bf16.msra.mxu0 %v443_v58 }
  0x40   :  { %318 = vmatprep.subr.msk.mxu0 %vm160_vm1, %v143_v60 }
  0x41   :  { %384 = vmatpush1.bf16.msra.mxu1 %v383_v59 }
  0x43   :  { %319 = vmatpush1.msk.msra.mxu0 %vm160_vm1, %v142_v61 }
  0x44   :  { %232 = vmatmul.mubr.f32.vlgmr.msra.gmra.mrb[0].mxu1 %v14_v62  ;;  %303 = vmatmul.mubr.f32.vlgmr.msra.gmra.mrb[0].mxu0 %v16_v63 }
 0x117   :  { %v233_v7 = vpop.f32.mrb[0].mxu1  ;;  %v304_v8 = vpop.f32.mrb[0].mxu0 }
 0x118   :  { %v234_v9 = vadd.f32 %v233_v7, %v149_v5  ;;  %v235_v10 = vpop.f32.mrb[1].mxu1  ;;  %v306_v11 = vpop.f32.mrb[1].mxu0 }
 0x119   :  { %v236_v12 = vadd.f32 %v235_v10, %v153_v6 }
 0x11a   :  { %v305_v13 = vadd.f32 %v304_v8, %v234_v9 }
 0x11b   :  { %v307_v14 = vadd.f32 %v306_v11, %v236_v12 }
 0x11c   :  { %v309_v15 = vmax.f32 %v305_v13, 0.0 }
 0x11d   :  { %v310_v16 = vmax.f32 %v307_v14, 0.0 }
 0x11e   :  { %311 = vst [vmem:[%s872_s3] sm:$0xff] %v309_v15 }
 0x11f   :  { %313 = vst.msk [vmem:[%s872_s3 + $0x8] sm:$0xff] %vm312_vm2, %v310_v16 }

</bundles_post_ra>
